<compile_context>
chip_gen: v5e
topology: v5e:2x2
jax: 0.10.0
libtpu: 0.0.40
codegen_flags: <defaults>
</compile_context>

<pallas_src>
import numpy as np
import jax
import jax.numpy as jnp
from jax.experimental import pallas as pl
from jax.experimental.pallas import tpu as pltpu

# ---- small, PGGAN-consistent hyper-parameters -------------------------------
N_EMB = 32                              # n_embedding
LEVELS = 2
GROWTH_RATE = 8
L1 = 4                                  # l1_size = (4, 4)
P_SP = L1 * L1                          # spatial positions per image (16)
NC = GROWTH_RATE * 2 ** (LEVELS - 1)    # level-1 channels (pow_gr=True) = 16
LRELU_SLOPE = 0.2
PIX_EPS = 1e-8
PAD_ROWS = 8                            # halo rows (max |row shift| = L1 + 1 = 5)
TAPS = [(dh, dw) for dh in (-1, 0, 1) for dw in (-1, 0, 1)]   # k = (dh+1)*3 + (dw+1)

_VMEM = pl.BlockSpec(memory_space=pltpu.MemorySpace.VMEM)


# ===================== trace-time (numpy) constants ===========================

def _tap_masks_np(batch):
    """(9, R, 1) validity masks for the 3x3 same-pad taps, batch-major rows.

    Row r = b*P_SP + h*L1 + w; tap (dh, dw) reads row r + dh*L1 + dw. The mask zeroes
    rows whose (h+dh, w+dw) falls outside the 4x4 tile. Any UNMASKED read stays inside
    the same batch's 16-row block (3x3 / stride-1 only), so cross-batch rows never leak.
    """
    p = np.arange(P_SP)
    h, w = p // L1, p % L1
    masks = np.zeros((9, P_SP), np.float32)
    for k, (dh, dw) in enumerate(TAPS):
        masks[k] = ((h + dh >= 0) & (h + dh < L1) & (w + dw >= 0) & (w + dw < L1))
    return np.ascontiguousarray(
        np.tile(masks, (1, batch)).reshape(9, batch * P_SP, 1).astype(np.float32))


def _gen_consts_np(batch):
    """Constant matrices for the in-vreg (B, P_SP*NC) -> (R, NC) relayout."""
    rmat = np.kron(np.eye(batch, dtype=np.float32),
                   np.ones((P_SP, 1), np.float32))                       # (R, B)   replicate rows
    msel = np.tile(np.kron(np.eye(P_SP, dtype=np.float32),
                           np.ones((1, NC), np.float32)), (batch, 1))    # (R, 256) keep own 16-lane chunk
    gfold = np.tile(np.eye(NC, dtype=np.float32), (P_SP, 1))             # (256,NC) fold lanes mod NC
    return rmat, msel, gfold


def _pool_const_np(batch):
    """(B, R) constant 4x4 average-pool matrix (1/16 on own-batch rows)."""
    return np.kron(np.eye(batch, dtype=np.float32),
                   np.full((1, P_SP), 1.0 / P_SP, np.float32))


# =========================== in-kernel helpers ================================

def _conv3x3(pad_ref, masks_ref, x, w_ref, b_ref, *, act, inv_c):
    """3x3 same-pad conv as 9 shifted-row MXU matmuls, activations VMEM/vreg resident.

    x: (R, cx) value; w_ref: (9, NC, Cout) (Cin zero-padded to NC when cx < NC);
    b_ref: (1, Cout); pad_ref: (R + 2*PAD_ROWS, NC) scratch whose halo rows stay zero.
    """
    rows, cx = x.shape
    cout = w_ref.shape[-1]
    pad_ref[PAD_ROWS:PAD_ROWS + rows, :cx] = x          # interior only; halos already zero
    acc = jnp.zeros((rows, cout), jnp.float32)
    for k, (dh, dw) in enumerate(TAPS):
        s = dh * L1 + dw
        xs = pad_ref[PAD_ROWS + s:PAD_ROWS + s + rows, :]   # static row-shifted view
        if (dh, dw) != (0, 0):
            xs = xs * masks_ref[k]                          # constant boundary mask (R, 1)
        acc = acc + jnp.dot(xs, w_ref[k], preferred_element_type=jnp.float32)
    y = acc + b_ref[...]
    y = jnp.where(y > 0, y, LRELU_SLOPE * y) if act == "lklu" else jax.nn.sigmoid(y)
    # pixel-wise feature norm: lane reduce (XLU) + rsqrt (EUP)
    ms = jnp.sum(y * y, axis=-1, keepdims=True) * inv_c
    return y * jax.lax.rsqrt(ms + PIX_EPS)


# =============================== fused kernels ================================

def _gen_kernel(z_ref, wl_ref, bl_ref, rmat_ref, msel_ref, gfold_ref, masks_ref,
                wc1_ref, bc1_ref, wrgb_ref, brgb_ref, o_ref, pad_ref):
    """Generator: Linear+LReLU+PixelWise -> conv3x3+LReLU+PixelWise
                  -> conv3x3(->3)+Sigmoid+PixelWise, fully fused in VMEM."""
    pad_ref[...] = jnp.zeros(pad_ref.shape, pad_ref.dtype)   # zero halos once per call

    # Linear as ONE wide matmul, then constant-matrix relayout (B, 256) -> (R, NC)
    # kept entirely in vregs (no scratch store/load, no in-kernel reshape).
    full = jnp.dot(z_ref[...], wl_ref[...], preferred_element_type=jnp.float32) + bl_ref[...]
    rep = jnp.dot(rmat_ref[...], full, preferred_element_type=jnp.float32)       # (R, 256)
    y = jnp.dot(rep * msel_ref[...], gfold_ref[...], preferred_element_type=jnp.float32)

    y = jnp.where(y > 0, y, LRELU_SLOPE * y)                                      # LeakyReLU(0.2)
    y = y * jax.lax.rsqrt(jnp.sum(y * y, -1, keepdims=True) * (1.0 / NC) + PIX_EPS)

    y = _conv3x3(pad_ref, masks_ref, y, wc1_ref, bc1_ref, act="lklu", inv_c=1.0 / NC)
    y = _conv3x3(pad_ref, masks_ref, y, wrgb_ref, brgb_ref, act="sigm", inv_c=1.0 / 3.0)
    o_ref[...] = y                                                                # (R, 3) batch-major


def _disc_kernel(x_ref, masks_ref, pool_ref, wdr_ref, bdr_ref, wd1_ref, bd1_ref, wdec_ref,
                 o_ref, pad_ref):
    """Discriminator: conv3x3(3->NC) -> conv3x3(NC->2NC) -> avgpool -> linear -> sigmoid."""
    pad_ref[...] = jnp.zeros(pad_ref.shape, pad_ref.dtype)   # zero halos + channel pad once

    x = _conv3x3(pad_ref, masks_ref, x_ref[...], wdr_ref, bdr_ref, act="lklu", inv_c=1.0 / NC)
    x = _conv3x3(pad_ref, masks_ref, x, wd1_ref, bd1_ref, act="lklu", inv_c=1.0 / (2 * NC))

    # 4x4 average pool: batch-major rows -> one constant (B, R) matmul.
    pooled = jnp.dot(pool_ref[...], x, preferred_element_type=jnp.float32)        # (B, 2*NC)

    # decide: Linear(2*NC -> 1, no bias) + Sigmoid as VPU mul + lane reduce (no N=1 MXU op).
    logit = jnp.sum(pooled * wdec_ref[...], axis=-1, keepdims=True)               # (B, 1)
    o_ref[...] = jax.nn.sigmoid(logit)


# ============================== forward wrapper ===============================

def pggan_forward(tensor, kp):
    """Mirrors PGGAN.forward at level 1 / no transition (kernel-layout params kp)."""
    if tensor.ndim == 2:
        # ---------------- generator ----------------
        B = tensor.shape[0]
        R = P_SP * B
        rmat, msel, gfold = _gen_consts_np(B)
        masks = _tap_masks_np(B)
        rows = pl.pallas_call(
            _gen_kernel,
            out_shape=jax.ShapeDtypeStruct((R, 3), jnp.float32),
            in_specs=[_VMEM] * 11,
            out_specs=_VMEM,
            scratch_shapes=[pltpu.VMEM((R + 2 * PAD_ROWS, NC), jnp.float32)],
        )(tensor, kp["w_lin"], kp["b_lin"], rmat, msel, gfold, masks,
          kp["wc1"], kp["bc1"], kp["wrgb"], kp["brgb"])
        # TODO(synk): fold this tiny 96-float NHWC->NCHW transpose into the kernel output.
        return rows.reshape(B, L1, L1, 3).transpose(0, 3, 1, 2)          # (B, 3, 4, 4)
    else:
        # ---------------- discriminator ----------------
        B = tensor.shape[0]
        R = P_SP * B
        masks = _tap_masks_np(B)
        pool = _pool_const_np(B)
        x = jax.image.resize(tensor, (B, 3, L1, L1), method="nearest")   # F.interpolate
        rows = x.transpose(0, 2, 3, 1).reshape(R, 3)                     # batch-major rows, 3 ch
        return pl.pallas_call(
            _disc_kernel,
            out_shape=jax.ShapeDtypeStruct((B, 1), jnp.float32),
            in_specs=[_VMEM] * 8,
            out_specs=_VMEM,
            scratch_shapes=[pltpu.VMEM((R + 2 * PAD_ROWS, NC), jnp.float32)],
        )(rows, masks, pool, kp["wd_rgb"], kp["bd_rgb"], kp["wd1"], kp["bd1"], kp["w_decide"])


# ============================== parameters ====================================

def make_params(key):
    """Canonical (reference-layout) parameters."""
    ks = jax.random.split(key, 11)
    gain = np.sqrt(2.0) / 4.0

    def eq(w, fan_in):                       # equalized-LR runtime scale, folded in
        return w * jnp.float32(gain / np.sqrt(fan_in))

    def convT_to_hwio(w):                    # (Cin,Cout,kh,kw) -> (kh,kw,Cin,Cout), flipped
        return jnp.flip(w, axis=(2, 3)).transpose(2, 3, 0, 1)

    def conv_to_hwio(w):                     # (Cout,Cin,kh,kw) -> (kh,kw,Cin,Cout)
        return w.transpose(2, 3, 1, 0)

    w1 = jax.random.normal(ks[0], (NC * P_SP, N_EMB), jnp.float32) * 0.1   # (out,in)
    b1 = jax.random.normal(ks[1], (NC * P_SP,), jnp.float32) * 0.01
    wt1 = jax.random.normal(ks[2], (NC, NC, 3, 3), jnp.float32)      # ConvT (Cin,Cout,k,k)
    bt1 = jax.random.normal(ks[3], (NC,), jnp.float32) * 0.01
    wtr = jax.random.normal(ks[4], (NC, 3, 3, 3), jnp.float32)       # ConvT -> RGB
    btr = jax.random.normal(ks[5], (3,), jnp.float32) * 0.01
    wdr = jax.random.normal(ks[6], (NC, 3, 3, 3), jnp.float32)       # Conv (Cout,Cin,k,k)
    bdr = jax.random.normal(ks[7], (NC,), jnp.float32) * 0.01
    wd1 = jax.random.normal(ks[8], (2 * NC, NC, 3, 3), jnp.float32)
    bd1 = jax.random.normal(ks[9], (2 * NC,), jnp.float32) * 0.01
    wdec = jax.random.normal(ks[10], (1, 2 * NC), jnp.float32) * 0.1  # Linear 2NC->1 no bias

    return dict(
        w1=w1.T, b1=b1.reshape(1, -1),
        wc1=convT_to_hwio(eq(wt1, NC * 9)), bc1=bt1.reshape(1, -1),
        wrgb=convT_to_hwio(eq(wtr, NC * 9)), brgb=btr.reshape(1, -1),
        wd_rgb=conv_to_hwio(eq(wdr, 3 * 9)), bd_rgb=bdr.reshape(1, -1),
        wd1=conv_to_hwio(eq(wd1, NC * 9)), bd1=bd1.reshape(1, -1),
        w_decide=wdec.T,
    )


def make_kernel_params(p):
    """One-time host-side re-layout of the canonical params for the fused kernels."""
    E = p["w1"].shape[0]
    kp = {}
    # Linear: reorder output columns from c*P_SP + p to p*NC + c so each row's own
    # 16-lane chunk of the (B, 256) matmul result is one spatial position.
    kp["w_lin"] = p["w1"].reshape(E, NC, P_SP).transpose(0, 2, 1).reshape(E, P_SP * NC)
    kp["b_lin"] = p["b1"].reshape(NC, P_SP).T.reshape(1, P_SP * NC)
    # Convs: HWIO (3,3,Cin,Cout) -> (9, Cin, Cout) taps (kh-major; matches TAPS order).
    kp["wc1"] = p["wc1"].reshape(9, NC, NC)
    kp["wrgb"] = p["wrgb"].reshape(9, NC, 3)
    wd_rgb = p["wd_rgb"].reshape(9, 3, NC)
    kp["wd_rgb"] = jnp.pad(wd_rgb, ((0, 0), (0, NC - 3), (0, 0)))     # Cin padded 3 -> NC
    kp["wd1"] = p["wd1"].reshape(9, NC, 2 * NC)
    kp["bc1"], kp["brgb"] = p["bc1"], p["brgb"]
    kp["bd_rgb"], kp["bd1"] = p["bd_rgb"], p["bd1"]
    kp["w_decide"] = p["w_decide"].T                                  # (1, 2*NC)
    return kp


# ============================== pure-JAX reference ============================

def _conv3x3_ref(x_nhwc, w_hwio, b, act, pixnorm):
    y = jax.lax.conv_general_dilated(
        x_nhwc, w_hwio, (1, 1), "SAME",
        dimension_numbers=("NHWC", "HWIO", "NHWC"),
        precision=jax.lax.Precision.HIGHEST) + b.reshape(1, 1, 1, -1)
    y = jnp.where(y > 0, y, LRELU_SLOPE * y) if act == "lklu" else jax.nn.sigmoid(y)
    if pixnorm:
        y = y * jax.lax.rsqrt(jnp.mean(y * y, axis=-1, keepdims=True) + PIX_EPS)
    return y


def generator_ref(z, p):
    B = z.shape[0]
    y = jnp.dot(z, p["w1"], precision=jax.lax.Precision.HIGHEST) + p["b1"]
    y = jnp.where(y > 0, y, LRELU_SLOPE * y)
    y = y.reshape(B, NC, L1, L1).transpose(0, 2, 3, 1)
    y = y * jax.lax.rsqrt(jnp.mean(y * y, axis=-1, keepdims=True) + PIX_EPS)
    y = _conv3x3_ref(y, p["wc1"], p["bc1"], "lklu", True)
    y = _conv3x3_ref(y, p["wrgb"], p["brgb"], "sigm", True)
    return y.transpose(0, 3, 1, 2)


def discriminator_ref(x_nchw, p):
    B = x_nchw.shape[0]
    x = jax.image.resize(x_nchw, (B, 3, L1, L1), method="nearest").transpose(0, 2, 3, 1)
    x = _conv3x3_ref(x, p["wd_rgb"], p["bd_rgb"], "lklu", True)
    x = _conv3x3_ref(x, p["wd1"], p["bd1"], "lklu", True)
    pooled = jnp.mean(x, axis=(1, 2))
    return jax.nn.sigmoid(jnp.dot(pooled, p["w_decide"], precision=jax.lax.Precision.HIGHEST))


# ================================== main ======================================

if __name__ == "__main__":
    key = jax.random.PRNGKey(0)
    pkey, zkey, xkey = jax.random.split(key, 3)
    params = make_params(pkey)
    kparams = make_kernel_params(params)

    B = 2
    z = jax.random.normal(zkey, (B, N_EMB), jnp.float32)            # latent (generator path)
    x_img = jax.random.uniform(xkey, (B, 3, L1, L1), jnp.float32)   # image (discriminator path)

    fwd = jax.jit(pggan_forward)

    g_out = jax.block_until_ready(fwd(z, kparams))        # (B, 3, 4, 4)
    d_out = jax.block_until_ready(fwd(x_img, kparams))    # (B, 1)

    g_ref = generator_ref(z, params)
    d_ref = discriminator_ref(x_img, params)

    assert g_out.shape == (B, 3, L1, L1) and d_out.shape == (B, 1)
    # Tolerance allows for MXU vs XLA f32-matmul precision differences; real layout/mask
    # bugs produce O(0.1-1) errors and are still caught.
    assert jnp.allclose(g_out, g_ref, atol=1e-2, rtol=1e-2), "generator mismatch"
    assert jnp.allclose(d_out, d_ref, atol=1e-2, rtol=1e-2), "discriminator mismatch"

    print("KERNEL_OK")
</pallas_src>

<mosaic_0001>
module attributes {stable_mosaic.version = 11 : i64} {
  func.func @_gen_kernel(%arg0: memref<2x32xf32, #tpu.memory_space<vmem>>, %arg1: memref<32x256xf32, #tpu.memory_space<vmem>>, %arg2: memref<1x256xf32, #tpu.memory_space<vmem>>, %arg3: memref<32x2xf32, #tpu.memory_space<vmem>>, %arg4: memref<32x256xf32, #tpu.memory_space<vmem>>, %arg5: memref<256x16xf32, #tpu.memory_space<vmem>>, %arg6: memref<9x32x1xf32, #tpu.memory_space<vmem>>, %arg7: memref<9x16x16xf32, #tpu.memory_space<vmem>>, %arg8: memref<1x16xf32, #tpu.memory_space<vmem>>, %arg9: memref<9x16x3xf32, #tpu.memory_space<vmem>>, %arg10: memref<1x3xf32, #tpu.memory_space<vmem>>, %arg11: memref<32x3xf32, #tpu.memory_space<vmem>>, %arg12: memref<48x16xf32, #tpu.memory_space<vmem>>) attributes {dimension_semantics = [], scalar_prefetch = 0 : i64, scratch_operands = 1 : i64, tpu.core_type = #tpu.core_type<tc>} {
    %cst = arith.constant 0.000000e+00 : f32
    %0 = vector.broadcast %cst : f32 to vector<48x16xf32>
    %c0 = arith.constant 0 : index
    %c0_0 = arith.constant 0 : index
    %1 = vector.load %arg12[%c0, %c0_0] : memref<48x16xf32, #tpu.memory_space<vmem>>, vector<48x16xf32>
    tpu.vector_store %arg12[%c0, %c0_0], %0 {strides = array<i32>} : memref<48x16xf32, #tpu.memory_space<vmem>>, vector<48x16xf32>,
    %c0_1 = arith.constant 0 : index
    %c0_2 = arith.constant 0 : index
    %2 = vector.load %arg0[%c0_1, %c0_2] : memref<2x32xf32, #tpu.memory_space<vmem>>, vector<2x32xf32>
    %c0_3 = arith.constant 0 : index
    %c0_4 = arith.constant 0 : index
    %3 = vector.load %arg1[%c0_3, %c0_4] : memref<32x256xf32, #tpu.memory_space<vmem>>, vector<32x256xf32>
    %cst_5 = arith.constant dense<0.000000e+00> : vector<2x256xf32>
    %4 = tpu.matmul %2, %3, %cst_5 {dimension_numbers = #tpu.dot_dimension_numbers<[1], [0], [0], [1], [0, 0, 1, 1], [], []>} : vector<2x32xf32>, vector<32x256xf32>, vector<2x256xf32> -> vector<2x256xf32>
    %c0_6 = arith.constant 0 : index
    %c0_7 = arith.constant 0 : index
    %5 = vector.load %arg2[%c0_6, %c0_7] : memref<1x256xf32, #tpu.memory_space<vmem>>, vector<1x256xf32>
    %6 = vector.broadcast %5 : vector<1x256xf32> to vector<2x256xf32>
    %7 = arith.addf %4, %6 : vector<2x256xf32>
    %c0_8 = arith.constant 0 : index
    %c0_9 = arith.constant 0 : index
    %8 = vector.load %arg3[%c0_8, %c0_9] : memref<32x2xf32, #tpu.memory_space<vmem>>, vector<32x2xf32>
    %cst_10 = arith.constant dense<0.000000e+00> : vector<32x256xf32>
    %9 = tpu.matmul %8, %7, %cst_10 {dimension_numbers = #tpu.dot_dimension_numbers<[1], [0], [0], [1], [0, 0, 1, 1], [], []>} : vector<32x2xf32>, vector<2x256xf32>, vector<32x256xf32> -> vector<32x256xf32>
    %c0_11 = arith.constant 0 : index
    %c0_12 = arith.constant 0 : index
    %10 = vector.load %arg4[%c0_11, %c0_12] : memref<32x256xf32, #tpu.memory_space<vmem>>, vector<32x256xf32>
    %11 = arith.mulf %9, %10 : vector<32x256xf32>
    %c0_13 = arith.constant 0 : index
    %c0_14 = arith.constant 0 : index
    %12 = vector.load %arg5[%c0_13, %c0_14] : memref<256x16xf32, #tpu.memory_space<vmem>>, vector<256x16xf32>
    %cst_15 = arith.constant dense<0.000000e+00> : vector<32x16xf32>
    %13 = tpu.matmul %11, %12, %cst_15 {dimension_numbers = #tpu.dot_dimension_numbers<[1], [0], [0], [1], [0, 0, 1, 1], [], []>} : vector<32x256xf32>, vector<256x16xf32>, vector<32x16xf32> -> vector<32x16xf32>
    %cst_16 = arith.constant 0.000000e+00 : f32
    %14 = vector.broadcast %cst_16 : f32 to vector<32x16xf32>
    %15 = arith.cmpf ogt, %13, %14 : vector<32x16xf32>
    %cst_17 = arith.constant 2.000000e-01 : f32
    %16 = vector.broadcast %cst_17 : f32 to vector<32x16xf32>
    %17 = arith.mulf %16, %13 : vector<32x16xf32>
    %18 = arith.select %15, %13, %17 : vector<32x16xi1>, vector<32x16xf32>
    %19 = arith.mulf %18, %18 : vector<32x16xf32>
    %cst_18 = arith.constant dense<0.000000e+00> : vector<32xf32>
    %20 = vector.multi_reduction <add>, %19, %cst_18 [1] : vector<32x16xf32> to vector<32xf32>
    %21 = vector.shape_cast %20 : vector<32xf32> to vector<32x1xf32>
    %cst_19 = arith.constant 6.250000e-02 : f32
    %22 = vector.broadcast %cst_19 : f32 to vector<32x1xf32>
    %23 = arith.mulf %21, %22 : vector<32x1xf32>
    %cst_20 = arith.constant 9.99999993E-9 : f32
    %24 = vector.broadcast %cst_20 : f32 to vector<32x1xf32>
    %25 = arith.addf %23, %24 : vector<32x1xf32>
    %26 = math.rsqrt %25 : vector<32x1xf32>
    %27 = vector.broadcast %26 : vector<32x1xf32> to vector<32x16xf32>
    %28 = arith.mulf %18, %27 : vector<32x16xf32>
    %c8 = arith.constant 8 : index
    %c0_21 = arith.constant 0 : index
    %29 = vector.load %arg12[%c8, %c0_21] : memref<48x16xf32, #tpu.memory_space<vmem>>, vector<32x16xf32>
    tpu.vector_store %arg12[%c8, %c0_21], %28 {strides = array<i32>} : memref<48x16xf32, #tpu.memory_space<vmem>>, vector<32x16xf32>,
    %cst_22 = arith.constant 0.000000e+00 : f32
    %30 = vector.broadcast %cst_22 : f32 to vector<32x16xf32>
    %c3 = arith.constant 3 : index
    %c0_23 = arith.constant 0 : index
    %31 = vector.load %arg12[%c3, %c0_23] : memref<48x16xf32, #tpu.memory_space<vmem>>, vector<32x16xf32>
    %c0_24 = arith.constant 0 : index
    %c0_25 = arith.constant 0 : index
    %c0_26 = arith.constant 0 : index
    %32 = vector.load %arg6[%c0_24, %c0_25, %c0_26] : memref<9x32x1xf32, #tpu.memory_space<vmem>>, vector<1x32x1xf32>
    %33 = vector.shape_cast %32 : vector<1x32x1xf32> to vector<32x1xf32>
    %34 = vector.broadcast %33 : vector<32x1xf32> to vector<32x16xf32>
    %35 = arith.mulf %31, %34 : vector<32x16xf32>
    %c0_27 = arith.constant 0 : index
    %c0_28 = arith.constant 0 : index
    %c0_29 = arith.constant 0 : index
    %36 = vector.load %arg7[%c0_27, %c0_28, %c0_29] : memref<9x16x16xf32, #tpu.memory_space<vmem>>, vector<1x16x16xf32>
    %37 = vector.shape_cast %36 : vector<1x16x16xf32> to vector<16x16xf32>
    %cst_30 = arith.constant dense<0.000000e+00> : vector<32x16xf32>
    %38 = tpu.matmul %35, %37, %cst_30 {dimension_numbers = #tpu.dot_dimension_numbers<[1], [0], [0], [1], [0, 0, 1, 1], [], []>} : vector<32x16xf32>, vector<16x16xf32>, vector<32x16xf32> -> vector<32x16xf32>
    %39 = arith.addf %30, %38 : vector<32x16xf32>
    %c4 = arith.constant 4 : index
    %c0_31 = arith.constant 0 : index
    %40 = vector.load %arg12[%c4, %c0_31] : memref<48x16xf32, #tpu.memory_space<vmem>>, vector<32x16xf32>
    %c1 = arith.constant 1 : index
    %c0_32 = arith.constant 0 : index
    %c0_33 = arith.constant 0 : index
    %41 = vector.load %arg6[%c1, %c0_32, %c0_33] : memref<9x32x1xf32, #tpu.memory_space<vmem>>, vector<1x32x1xf32>
    %42 = vector.shape_cast %41 : vector<1x32x1xf32> to vector<32x1xf32>
    %43 = vector.broadcast %42 : vector<32x1xf32> to vector<32x16xf32>
    %44 = arith.mulf %40, %43 : vector<32x16xf32>
    %c1_34 = arith.constant 1 : index
    %c0_35 = arith.constant 0 : index
    %c0_36 = arith.constant 0 : index
    %45 = vector.load %arg7[%c1_34, %c0_35, %c0_36] : memref<9x16x16xf32, #tpu.memory_space<vmem>>, vector<1x16x16xf32>
    %46 = vector.shape_cast %45 : vector<1x16x16xf32> to vector<16x16xf32>
    %cst_37 = arith.constant dense<0.000000e+00> : vector<32x16xf32>
    %47 = tpu.matmul %44, %46, %cst_37 {dimension_numbers = #tpu.dot_dimension_numbers<[1], [0], [0], [1], [0, 0, 1, 1], [], []>} : vector<32x16xf32>, vector<16x16xf32>, vector<32x16xf32> -> vector<32x16xf32>
    %48 = arith.addf %39, %47 : vector<32x16xf32>
    %c5 = arith.constant 5 : index
    %c0_38 = arith.constant 0 : index
    %49 = vector.load %arg12[%c5, %c0_38] : memref<48x16xf32, #tpu.memory_space<vmem>>, vector<32x16xf32>
    %c2 = arith.constant 2 : index
    %c0_39 = arith.constant 0 : index
    %c0_40 = arith.constant 0 : index
    %50 = vector.load %arg6[%c2, %c0_39, %c0_40] : memref<9x32x1xf32, #tpu.memory_space<vmem>>, vector<1x32x1xf32>
    %51 = vector.shape_cast %50 : vector<1x32x1xf32> to vector<32x1xf32>
    %52 = vector.broadcast %51 : vector<32x1xf32> to vector<32x16xf32>
    %53 = arith.mulf %49, %52 : vector<32x16xf32>
    %c2_41 = arith.constant 2 : index
    %c0_42 = arith.constant 0 : index
    %c0_43 = arith.constant 0 : index
    %54 = vector.load %arg7[%c2_41, %c0_42, %c0_43] : memref<9x16x16xf32, #tpu.memory_space<vmem>>, vector<1x16x16xf32>
    %55 = vector.shape_cast %54 : vector<1x16x16xf32> to vector<16x16xf32>
    %cst_44 = arith.constant dense<0.000000e+00> : vector<32x16xf32>
    %56 = tpu.matmul %53, %55, %cst_44 {dimension_numbers = #tpu.dot_dimension_numbers<[1], [0], [0], [1], [0, 0, 1, 1], [], []>} : vector<32x16xf32>, vector<16x16xf32>, vector<32x16xf32> -> vector<32x16xf32>
    %57 = arith.addf %48, %56 : vector<32x16xf32>
    %c7 = arith.constant 7 : index
    %c0_45 = arith.constant 0 : index
    %58 = vector.load %arg12[%c7, %c0_45] : memref<48x16xf32, #tpu.memory_space<vmem>>, vector<32x16xf32>
    %c3_46 = arith.constant 3 : index
    %c0_47 = arith.constant 0 : index
    %c0_48 = arith.constant 0 : index
    %59 = vector.load %arg6[%c3_46, %c0_47, %c0_48] : memref<9x32x1xf32, #tpu.memory_space<vmem>>, vector<1x32x1xf32>
    %60 = vector.shape_cast %59 : vector<1x32x1xf32> to vector<32x1xf32>
    %61 = vector.broadcast %60 : vector<32x1xf32> to vector<32x16xf32>
    %62 = arith.mulf %58, %61 : vector<32x16xf32>
    %c3_49 = arith.constant 3 : index
    %c0_50 = arith.constant 0 : index
    %c0_51 = arith.constant 0 : index
    %63 = vector.load %arg7[%c3_49, %c0_50, %c0_51] : memref<9x16x16xf32, #tpu.memory_space<vmem>>, vector<1x16x16xf32>
    %64 = vector.shape_cast %63 : vector<1x16x16xf32> to vector<16x16xf32>
    %cst_52 = arith.constant dense<0.000000e+00> : vector<32x16xf32>
    %65 = tpu.matmul %62, %64, %cst_52 {dimension_numbers = #tpu.dot_dimension_numbers<[1], [0], [0], [1], [0, 0, 1, 1], [], []>} : vector<32x16xf32>, vector<16x16xf32>, vector<32x16xf32> -> vector<32x16xf32>
    %66 = arith.addf %57, %65 : vector<32x16xf32>
    %c8_53 = arith.constant 8 : index
    %c0_54 = arith.constant 0 : index
    %67 = vector.load %arg12[%c8_53, %c0_54] : memref<48x16xf32, #tpu.memory_space<vmem>>, vector<32x16xf32>
    %c4_55 = arith.constant 4 : index
    %c0_56 = arith.constant 0 : index
    %c0_57 = arith.constant 0 : index
    %68 = vector.load %arg7[%c4_55, %c0_56, %c0_57] : memref<9x16x16xf32, #tpu.memory_space<vmem>>, vector<1x16x16xf32>
    %69 = vector.shape_cast %68 : vector<1x16x16xf32> to vector<16x16xf32>
    %cst_58 = arith.constant dense<0.000000e+00> : vector<32x16xf32>
    %70 = tpu.matmul %67, %69, %cst_58 {dimension_numbers = #tpu.dot_dimension_numbers<[1], [0], [0], [1], [0, 0, 1, 1], [], []>} : vector<32x16xf32>, vector<16x16xf32>, vector<32x16xf32> -> vector<32x16xf32>
    %71 = arith.addf %66, %70 : vector<32x16xf32>
    %c9 = arith.constant 9 : index
    %c0_59 = arith.constant 0 : index
    %72 = vector.load %arg12[%c9, %c0_59] : memref<48x16xf32, #tpu.memory_space<vmem>>, vector<32x16xf32>
    %c5_60 = arith.constant 5 : index
    %c0_61 = arith.constant 0 : index
    %c0_62 = arith.constant 0 : index
    %73 = vector.load %arg6[%c5_60, %c0_61, %c0_62] : memref<9x32x1xf32, #tpu.memory_space<vmem>>, vector<1x32x1xf32>
    %74 = vector.shape_cast %73 : vector<1x32x1xf32> to vector<32x1xf32>
    %75 = vector.broadcast %74 : vector<32x1xf32> to vector<32x16xf32>
    %76 = arith.mulf %72, %75 : vector<32x16xf32>
    %c5_63 = arith.constant 5 : index
    %c0_64 = arith.constant 0 : index
    %c0_65 = arith.constant 0 : index
    %77 = vector.load %arg7[%c5_63, %c0_64, %c0_65] : memref<9x16x16xf32, #tpu.memory_space<vmem>>, vector<1x16x16xf32>
    %78 = vector.shape_cast %77 : vector<1x16x16xf32> to vector<16x16xf32>
    %cst_66 = arith.constant dense<0.000000e+00> : vector<32x16xf32>
    %79 = tpu.matmul %76, %78, %cst_66 {dimension_numbers = #tpu.dot_dimension_numbers<[1], [0], [0], [1], [0, 0, 1, 1], [], []>} : vector<32x16xf32>, vector<16x16xf32>, vector<32x16xf32> -> vector<32x16xf32>
    %80 = arith.addf %71, %79 : vector<32x16xf32>
    %c11 = arith.constant 11 : index
    %c0_67 = arith.constant 0 : index
    %81 = vector.load %arg12[%c11, %c0_67] : memref<48x16xf32, #tpu.memory_space<vmem>>, vector<32x16xf32>
    %c6 = arith.constant 6 : index
    %c0_68 = arith.constant 0 : index
    %c0_69 = arith.constant 0 : index
    %82 = vector.load %arg6[%c6, %c0_68, %c0_69] : memref<9x32x1xf32, #tpu.memory_space<vmem>>, vector<1x32x1xf32>
    %83 = vector.shape_cast %82 : vector<1x32x1xf32> to vector<32x1xf32>
    %84 = vector.broadcast %83 : vector<32x1xf32> to vector<32x16xf32>
    %85 = arith.mulf %81, %84 : vector<32x16xf32>
    %c6_70 = arith.constant 6 : index
    %c0_71 = arith.constant 0 : index
    %c0_72 = arith.constant 0 : index
    %86 = vector.load %arg7[%c6_70, %c0_71, %c0_72] : memref<9x16x16xf32, #tpu.memory_space<vmem>>, vector<1x16x16xf32>
    %87 = vector.shape_cast %86 : vector<1x16x16xf32> to vector<16x16xf32>
    %cst_73 = arith.constant dense<0.000000e+00> : vector<32x16xf32>
    %88 = tpu.matmul %85, %87, %cst_73 {dimension_numbers = #tpu.dot_dimension_numbers<[1], [0], [0], [1], [0, 0, 1, 1], [], []>} : vector<32x16xf32>, vector<16x16xf32>, vector<32x16xf32> -> vector<32x16xf32>
    %89 = arith.addf %80, %88 : vector<32x16xf32>
    %c12 = arith.constant 12 : index
    %c0_74 = arith.constant 0 : index
    %90 = vector.load %arg12[%c12, %c0_74] : memref<48x16xf32, #tpu.memory_space<vmem>>, vector<32x16xf32>
    %c7_75 = arith.constant 7 : index
    %c0_76 = arith.constant 0 : index
    %c0_77 = arith.constant 0 : index
    %91 = vector.load %arg6[%c7_75, %c0_76, %c0_77] : memref<9x32x1xf32, #tpu.memory_space<vmem>>, vector<1x32x1xf32>
    %92 = vector.shape_cast %91 : vector<1x32x1xf32> to vector<32x1xf32>
    %93 = vector.broadcast %92 : vector<32x1xf32> to vector<32x16xf32>
    %94 = arith.mulf %90, %93 : vector<32x16xf32>
    %c7_78 = arith.constant 7 : index
    %c0_79 = arith.constant 0 : index
    %c0_80 = arith.constant 0 : index
    %95 = vector.load %arg7[%c7_78, %c0_79, %c0_80] : memref<9x16x16xf32, #tpu.memory_space<vmem>>, vector<1x16x16xf32>
    %96 = vector.shape_cast %95 : vector<1x16x16xf32> to vector<16x16xf32>
    %cst_81 = arith.constant dense<0.000000e+00> : vector<32x16xf32>
    %97 = tpu.matmul %94, %96, %cst_81 {dimension_numbers = #tpu.dot_dimension_numbers<[1], [0], [0], [1], [0, 0, 1, 1], [], []>} : vector<32x16xf32>, vector<16x16xf32>, vector<32x16xf32> -> vector<32x16xf32>
    %98 = arith.addf %89, %97 : vector<32x16xf32>
    %c13 = arith.constant 13 : index
    %c0_82 = arith.constant 0 : index
    %99 = vector.load %arg12[%c13, %c0_82] : memref<48x16xf32, #tpu.memory_space<vmem>>, vector<32x16xf32>
    %c8_83 = arith.constant 8 : index
    %c0_84 = arith.constant 0 : index
    %c0_85 = arith.constant 0 : index
    %100 = vector.load %arg6[%c8_83, %c0_84, %c0_85] : memref<9x32x1xf32, #tpu.memory_space<vmem>>, vector<1x32x1xf32>
    %101 = vector.shape_cast %100 : vector<1x32x1xf32> to vector<32x1xf32>
    %102 = vector.broadcast %101 : vector<32x1xf32> to vector<32x16xf32>
    %103 = arith.mulf %99, %102 : vector<32x16xf32>
    %c8_86 = arith.constant 8 : index
    %c0_87 = arith.constant 0 : index
    %c0_88 = arith.constant 0 : index
    %104 = vector.load %arg7[%c8_86, %c0_87, %c0_88] : memref<9x16x16xf32, #tpu.memory_space<vmem>>, vector<1x16x16xf32>
    %105 = vector.shape_cast %104 : vector<1x16x16xf32> to vector<16x16xf32>
    %cst_89 = arith.constant dense<0.000000e+00> : vector<32x16xf32>
    %106 = tpu.matmul %103, %105, %cst_89 {dimension_numbers = #tpu.dot_dimension_numbers<[1], [0], [0], [1], [0, 0, 1, 1], [], []>} : vector<32x16xf32>, vector<16x16xf32>, vector<32x16xf32> -> vector<32x16xf32>
    %107 = arith.addf %98, %106 : vector<32x16xf32>
    %c0_90 = arith.constant 0 : index
    %c0_91 = arith.constant 0 : index
    %108 = vector.load %arg8[%c0_90, %c0_91] : memref<1x16xf32, #tpu.memory_space<vmem>>, vector<1x16xf32>
    %109 = vector.broadcast %108 : vector<1x16xf32> to vector<32x16xf32>
    %110 = arith.addf %107, %109 : vector<32x16xf32>
    %cst_92 = arith.constant 0.000000e+00 : f32
    %111 = vector.broadcast %cst_92 : f32 to vector<32x16xf32>
    %112 = arith.cmpf ogt, %110, %111 : vector<32x16xf32>
    %cst_93 = arith.constant 2.000000e-01 : f32
    %113 = vector.broadcast %cst_93 : f32 to vector<32x16xf32>
    %114 = arith.mulf %113, %110 : vector<32x16xf32>
    %115 = arith.select %112, %110, %114 : vector<32x16xi1>, vector<32x16xf32>
    %116 = arith.mulf %115, %115 : vector<32x16xf32>
    %cst_94 = arith.constant dense<0.000000e+00> : vector<32xf32>
    %117 = vector.multi_reduction <add>, %116, %cst_94 [1] : vector<32x16xf32> to vector<32xf32>
    %118 = vector.shape_cast %117 : vector<32xf32> to vector<32x1xf32>
    %cst_95 = arith.constant 6.250000e-02 : f32
    %119 = vector.broadcast %cst_95 : f32 to vector<32x1xf32>
    %120 = arith.mulf %118, %119 : vector<32x1xf32>
    %cst_96 = arith.constant 9.99999993E-9 : f32
    %121 = vector.broadcast %cst_96 : f32 to vector<32x1xf32>
    %122 = arith.addf %120, %121 : vector<32x1xf32>
    %123 = math.rsqrt %122 : vector<32x1xf32>
    %124 = vector.broadcast %123 : vector<32x1xf32> to vector<32x16xf32>
    %125 = arith.mulf %115, %124 : vector<32x16xf32>
    %c8_97 = arith.constant 8 : index
    %c0_98 = arith.constant 0 : index
    %126 = vector.load %arg12[%c8_97, %c0_98] : memref<48x16xf32, #tpu.memory_space<vmem>>, vector<32x16xf32>
    tpu.vector_store %arg12[%c8_97, %c0_98], %125 {strides = array<i32>} : memref<48x16xf32, #tpu.memory_space<vmem>>, vector<32x16xf32>,
    %cst_99 = arith.constant 0.000000e+00 : f32
    %127 = vector.broadcast %cst_99 : f32 to vector<32x3xf32>
    %c3_100 = arith.constant 3 : index
    %c0_101 = arith.constant 0 : index
    %128 = vector.load %arg12[%c3_100, %c0_101] : memref<48x16xf32, #tpu.memory_space<vmem>>, vector<32x16xf32>
    %c0_102 = arith.constant 0 : index
    %c0_103 = arith.constant 0 : index
    %c0_104 = arith.constant 0 : index
    %129 = vector.load %arg6[%c0_102, %c0_103, %c0_104] : memref<9x32x1xf32, #tpu.memory_space<vmem>>, vector<1x32x1xf32>
    %130 = vector.shape_cast %129 : vector<1x32x1xf32> to vector<32x1xf32>
    %131 = vector.broadcast %130 : vector<32x1xf32> to vector<32x16xf32>
    %132 = arith.mulf %128, %131 : vector<32x16xf32>
    %c0_105 = arith.constant 0 : index
    %c0_106 = arith.constant 0 : index
    %c0_107 = arith.constant 0 : index
    %133 = vector.load %arg9[%c0_105, %c0_106, %c0_107] : memref<9x16x3xf32, #tpu.memory_space<vmem>>, vector<1x16x3xf32>
    %134 = vector.shape_cast %133 : vector<1x16x3xf32> to vector<16x3xf32>
    %cst_108 = arith.constant dense<0.000000e+00> : vector<32x3xf32>
    %135 = tpu.matmul %132, %134, %cst_108 {dimension_numbers = #tpu.dot_dimension_numbers<[1], [0], [0], [1], [0, 0, 1, 1], [], []>} : vector<32x16xf32>, vector<16x3xf32>, vector<32x3xf32> -> vector<32x3xf32>
    %136 = arith.addf %127, %135 : vector<32x3xf32>
    %c4_109 = arith.constant 4 : index
    %c0_110 = arith.constant 0 : index
    %137 = vector.load %arg12[%c4_109, %c0_110] : memref<48x16xf32, #tpu.memory_space<vmem>>, vector<32x16xf32>
    %c1_111 = arith.constant 1 : index
    %c0_112 = arith.constant 0 : index
    %c0_113 = arith.constant 0 : index
    %138 = vector.load %arg6[%c1_111, %c0_112, %c0_113] : memref<9x32x1xf32, #tpu.memory_space<vmem>>, vector<1x32x1xf32>
    %139 = vector.shape_cast %138 : vector<1x32x1xf32> to vector<32x1xf32>
    %140 = vector.broadcast %139 : vector<32x1xf32> to vector<32x16xf32>
    %141 = arith.mulf %137, %140 : vector<32x16xf32>
    %c1_114 = arith.constant 1 : index
    %c0_115 = arith.constant 0 : index
    %c0_116 = arith.constant 0 : index
    %142 = vector.load %arg9[%c1_114, %c0_115, %c0_116] : memref<9x16x3xf32, #tpu.memory_space<vmem>>, vector<1x16x3xf32>
    %143 = vector.shape_cast %142 : vector<1x16x3xf32> to vector<16x3xf32>
    %cst_117 = arith.constant dense<0.000000e+00> : vector<32x3xf32>
    %144 = tpu.matmul %141, %143, %cst_117 {dimension_numbers = #tpu.dot_dimension_numbers<[1], [0], [0], [1], [0, 0, 1, 1], [], []>} : vector<32x16xf32>, vector<16x3xf32>, vector<32x3xf32> -> vector<32x3xf32>
    %145 = arith.addf %136, %144 : vector<32x3xf32>
    %c5_118 = arith.constant 5 : index
    %c0_119 = arith.constant 0 : index
    %146 = vector.load %arg12[%c5_118, %c0_119] : memref<48x16xf32, #tpu.memory_space<vmem>>, vector<32x16xf32>
    %c2_120 = arith.constant 2 : index
    %c0_121 = arith.constant 0 : index
    %c0_122 = arith.constant 0 : index
    %147 = vector.load %arg6[%c2_120, %c0_121, %c0_122] : memref<9x32x1xf32, #tpu.memory_space<vmem>>, vector<1x32x1xf32>
    %148 = vector.shape_cast %147 : vector<1x32x1xf32> to vector<32x1xf32>
    %149 = vector.broadcast %148 : vector<32x1xf32> to vector<32x16xf32>
    %150 = arith.mulf %146, %149 : vector<32x16xf32>
    %c2_123 = arith.constant 2 : index
    %c0_124 = arith.constant 0 : index
    %c0_125 = arith.constant 0 : index
    %151 = vector.load %arg9[%c2_123, %c0_124, %c0_125] : memref<9x16x3xf32, #tpu.memory_space<vmem>>, vector<1x16x3xf32>
    %152 = vector.shape_cast %151 : vector<1x16x3xf32> to vector<16x3xf32>
    %cst_126 = arith.constant dense<0.000000e+00> : vector<32x3xf32>
    %153 = tpu.matmul %150, %152, %cst_126 {dimension_numbers = #tpu.dot_dimension_numbers<[1], [0], [0], [1], [0, 0, 1, 1], [], []>} : vector<32x16xf32>, vector<16x3xf32>, vector<32x3xf32> -> vector<32x3xf32>
    %154 = arith.addf %145, %153 : vector<32x3xf32>
    %c7_127 = arith.constant 7 : index
    %c0_128 = arith.constant 0 : index
    %155 = vector.load %arg12[%c7_127, %c0_128] : memref<48x16xf32, #tpu.memory_space<vmem>>, vector<32x16xf32>
    %c3_129 = arith.constant 3 : index
    %c0_130 = arith.constant 0 : index
    %c0_131 = arith.constant 0 : index
    %156 = vector.load %arg6[%c3_129, %c0_130, %c0_131] : memref<9x32x1xf32, #tpu.memory_space<vmem>>, vector<1x32x1xf32>
    %157 = vector.shape_cast %156 : vector<1x32x1xf32> to vector<32x1xf32>
    %158 = vector.broadcast %157 : vector<32x1xf32> to vector<32x16xf32>
    %159 = arith.mulf %155, %158 : vector<32x16xf32>
    %c3_132 = arith.constant 3 : index
    %c0_133 = arith.constant 0 : index
    %c0_134 = arith.constant 0 : index
    %160 = vector.load %arg9[%c3_132, %c0_133, %c0_134] : memref<9x16x3xf32, #tpu.memory_space<vmem>>, vector<1x16x3xf32>
    %161 = vector.shape_cast %160 : vector<1x16x3xf32> to vector<16x3xf32>
    %cst_135 = arith.constant dense<0.000000e+00> : vector<32x3xf32>
    %162 = tpu.matmul %159, %161, %cst_135 {dimension_numbers = #tpu.dot_dimension_numbers<[1], [0], [0], [1], [0, 0, 1, 1], [], []>} : vector<32x16xf32>, vector<16x3xf32>, vector<32x3xf32> -> vector<32x3xf32>
    %163 = arith.addf %154, %162 : vector<32x3xf32>
    %c8_136 = arith.constant 8 : index
    %c0_137 = arith.constant 0 : index
    %164 = vector.load %arg12[%c8_136, %c0_137] : memref<48x16xf32, #tpu.memory_space<vmem>>, vector<32x16xf32>
    %c4_138 = arith.constant 4 : index
    %c0_139 = arith.constant 0 : index
    %c0_140 = arith.constant 0 : index
    %165 = vector.load %arg9[%c4_138, %c0_139, %c0_140] : memref<9x16x3xf32, #tpu.memory_space<vmem>>, vector<1x16x3xf32>
    %166 = vector.shape_cast %165 : vector<1x16x3xf32> to vector<16x3xf32>
    %cst_141 = arith.constant dense<0.000000e+00> : vector<32x3xf32>
    %167 = tpu.matmul %164, %166, %cst_141 {dimension_numbers = #tpu.dot_dimension_numbers<[1], [0], [0], [1], [0, 0, 1, 1], [], []>} : vector<32x16xf32>, vector<16x3xf32>, vector<32x3xf32> -> vector<32x3xf32>
    %168 = arith.addf %163, %167 : vector<32x3xf32>
    %c9_142 = arith.constant 9 : index
    %c0_143 = arith.constant 0 : index
    %169 = vector.load %arg12[%c9_142, %c0_143] : memref<48x16xf32, #tpu.memory_space<vmem>>, vector<32x16xf32>
    %c5_144 = arith.constant 5 : index
    %c0_145 = arith.constant 0 : index
    %c0_146 = arith.constant 0 : index
    %170 = vector.load %arg6[%c5_144, %c0_145, %c0_146] : memref<9x32x1xf32, #tpu.memory_space<vmem>>, vector<1x32x1xf32>
    %171 = vector.shape_cast %170 : vector<1x32x1xf32> to vector<32x1xf32>
    %172 = vector.broadcast %171 : vector<32x1xf32> to vector<32x16xf32>
    %173 = arith.mulf %169, %172 : vector<32x16xf32>
    %c5_147 = arith.constant 5 : index
    %c0_148 = arith.constant 0 : index
    %c0_149 = arith.constant 0 : index
    %174 = vector.load %arg9[%c5_147, %c0_148, %c0_149] : memref<9x16x3xf32, #tpu.memory_space<vmem>>, vector<1x16x3xf32>
    %175 = vector.shape_cast %174 : vector<1x16x3xf32> to vector<16x3xf32>
    %cst_150 = arith.constant dense<0.000000e+00> : vector<32x3xf32>
    %176 = tpu.matmul %173, %175, %cst_150 {dimension_numbers = #tpu.dot_dimension_numbers<[1], [0], [0], [1], [0, 0, 1, 1], [], []>} : vector<32x16xf32>, vector<16x3xf32>, vector<32x3xf32> -> vector<32x3xf32>
    %177 = arith.addf %168, %176 : vector<32x3xf32>
    %c11_151 = arith.constant 11 : index
    %c0_152 = arith.constant 0 : index
    %178 = vector.load %arg12[%c11_151, %c0_152] : memref<48x16xf32, #tpu.memory_space<vmem>>, vector<32x16xf32>
    %c6_153 = arith.constant 6 : index
    %c0_154 = arith.constant 0 : index
    %c0_155 = arith.constant 0 : index
    %179 = vector.load %arg6[%c6_153, %c0_154, %c0_155] : memref<9x32x1xf32, #tpu.memory_space<vmem>>, vector<1x32x1xf32>
    %180 = vector.shape_cast %179 : vector<1x32x1xf32> to vector<32x1xf32>
    %181 = vector.broadcast %180 : vector<32x1xf32> to vector<32x16xf32>
    %182 = arith.mulf %178, %181 : vector<32x16xf32>
    %c6_156 = arith.constant 6 : index
    %c0_157 = arith.constant 0 : index
    %c0_158 = arith.constant 0 : index
    %183 = vector.load %arg9[%c6_156, %c0_157, %c0_158] : memref<9x16x3xf32, #tpu.memory_space<vmem>>, vector<1x16x3xf32>
    %184 = vector.shape_cast %183 : vector<1x16x3xf32> to vector<16x3xf32>
    %cst_159 = arith.constant dense<0.000000e+00> : vector<32x3xf32>
    %185 = tpu.matmul %182, %184, %cst_159 {dimension_numbers = #tpu.dot_dimension_numbers<[1], [0], [0], [1], [0, 0, 1, 1], [], []>} : vector<32x16xf32>, vector<16x3xf32>, vector<32x3xf32> -> vector<32x3xf32>
    %186 = arith.addf %177, %185 : vector<32x3xf32>
    %c12_160 = arith.constant 12 : index
    %c0_161 = arith.constant 0 : index
    %187 = vector.load %arg12[%c12_160, %c0_161] : memref<48x16xf32, #tpu.memory_space<vmem>>, vector<32x16xf32>
    %c7_162 = arith.constant 7 : index
    %c0_163 = arith.constant 0 : index
    %c0_164 = arith.constant 0 : index
    %188 = vector.load %arg6[%c7_162, %c0_163, %c0_164] : memref<9x32x1xf32, #tpu.memory_space<vmem>>, vector<1x32x1xf32>
    %189 = vector.shape_cast %188 : vector<1x32x1xf32> to vector<32x1xf32>
    %190 = vector.broadcast %189 : vector<32x1xf32> to vector<32x16xf32>
    %191 = arith.mulf %187, %190 : vector<32x16xf32>
    %c7_165 = arith.constant 7 : index
    %c0_166 = arith.constant 0 : index
    %c0_167 = arith.constant 0 : index
    %192 = vector.load %arg9[%c7_165, %c0_166, %c0_167] : memref<9x16x3xf32, #tpu.memory_space<vmem>>, vector<1x16x3xf32>
    %193 = vector.shape_cast %192 : vector<1x16x3xf32> to vector<16x3xf32>
    %cst_168 = arith.constant dense<0.000000e+00> : vector<32x3xf32>
    %194 = tpu.matmul %191, %193, %cst_168 {dimension_numbers = #tpu.dot_dimension_numbers<[1], [0], [0], [1], [0, 0, 1, 1], [], []>} : vector<32x16xf32>, vector<16x3xf32>, vector<32x3xf32> -> vector<32x3xf32>
    %195 = arith.addf %186, %194 : vector<32x3xf32>
    %c13_169 = arith.constant 13 : index
    %c0_170 = arith.constant 0 : index
    %196 = vector.load %arg12[%c13_169, %c0_170] : memref<48x16xf32, #tpu.memory_space<vmem>>, vector<32x16xf32>
    %c8_171 = arith.constant 8 : index
    %c0_172 = arith.constant 0 : index
    %c0_173 = arith.constant 0 : index
    %197 = vector.load %arg6[%c8_171, %c0_172, %c0_173] : memref<9x32x1xf32, #tpu.memory_space<vmem>>, vector<1x32x1xf32>
    %198 = vector.shape_cast %197 : vector<1x32x1xf32> to vector<32x1xf32>
    %199 = vector.broadcast %198 : vector<32x1xf32> to vector<32x16xf32>
    %200 = arith.mulf %196, %199 : vector<32x16xf32>
    %c8_174 = arith.constant 8 : index
    %c0_175 = arith.constant 0 : index
    %c0_176 = arith.constant 0 : index
    %201 = vector.load %arg9[%c8_174, %c0_175, %c0_176] : memref<9x16x3xf32, #tpu.memory_space<vmem>>, vector<1x16x3xf32>
    %202 = vector.shape_cast %201 : vector<1x16x3xf32> to vector<16x3xf32>
    %cst_177 = arith.constant dense<0.000000e+00> : vector<32x3xf32>
    %203 = tpu.matmul %200, %202, %cst_177 {dimension_numbers = #tpu.dot_dimension_numbers<[1], [0], [0], [1], [0, 0, 1, 1], [], []>} : vector<32x16xf32>, vector<16x3xf32>, vector<32x3xf32> -> vector<32x3xf32>
    %204 = arith.addf %195, %203 : vector<32x3xf32>
    %c0_178 = arith.constant 0 : index
    %c0_179 = arith.constant 0 : index
    %205 = vector.load %arg10[%c0_178, %c0_179] : memref<1x3xf32, #tpu.memory_space<vmem>>, vector<1x3xf32>
    %206 = vector.broadcast %205 : vector<1x3xf32> to vector<32x3xf32>
    %207 = arith.addf %204, %206 : vector<32x3xf32>
    %208 = arith.negf %207 : vector<32x3xf32>
    %209 = math.exp %208 : vector<32x3xf32>
    %cst_180 = arith.constant 1.000000e+00 : f32
    %210 = vector.broadcast %cst_180 : f32 to vector<32x3xf32>
    %211 = arith.addf %210, %209 : vector<32x3xf32>
    %212 = arith.divf %210, %211 : vector<32x3xf32>
    %213 = arith.mulf %212, %212 : vector<32x3xf32>
    %cst_181 = arith.constant dense<0.000000e+00> : vector<32xf32>
    %214 = vector.multi_reduction <add>, %213, %cst_181 [1] : vector<32x3xf32> to vector<32xf32>
    %215 = vector.shape_cast %214 : vector<32xf32> to vector<32x1xf32>
    %cst_182 = arith.constant 0.333333343 : f32
    %216 = vector.broadcast %cst_182 : f32 to vector<32x1xf32>
    %217 = arith.mulf %215, %216 : vector<32x1xf32>
    %cst_183 = arith.constant 9.99999993E-9 : f32
    %218 = vector.broadcast %cst_183 : f32 to vector<32x1xf32>
    %219 = arith.addf %217, %218 : vector<32x1xf32>
    %220 = math.rsqrt %219 : vector<32x1xf32>
    %221 = vector.broadcast %220 : vector<32x1xf32> to vector<32x3xf32>
    %222 = arith.mulf %212, %221 : vector<32x3xf32>
    %c0_184 = arith.constant 0 : index
    %c0_185 = arith.constant 0 : index
    %223 = vector.load %arg11[%c0_184, %c0_185] : memref<32x3xf32, #tpu.memory_space<vmem>>, vector<32x3xf32>
    tpu.vector_store %arg11[%c0_184, %c0_185], %222 {strides = array<i32>} : memref<32x3xf32, #tpu.memory_space<vmem>>, vector<32x3xf32>,
    return
  }
}

</mosaic_0001>

<bundles_post_ra>
// kernel: pggan_forward.1
= control target key start
LH: loop header
LB: loop body
LE: loop exit
PB: predicated region body
PF: predicated region fallthrough
CT: control target
= control target key end

     0   :  { %16 = vsyncpa [#allocation4], 0  ;;  %s2974_s0 = inlined_call_operand.vmem [shape: f32[2,32], index: 0, kind: input, shape index: {}]   ;;  %s2975_s1 = inlined_call_operand.hbm [shape: f32[32,256], index: 1, kind: input, shape index: {}]   ;;  %s2976_s2 = inlined_call_operand.vmem [shape: f32[1,256], index: 2, kind: input, shape index: {}]   ;;  %s2977_s3 = inlined_call_operand.vmem [shape: f32[32,2], index: 3, kind: input, shape index: {}]   ;;  %s2978_s4 = inlined_call_operand.hbm [shape: f32[32,256], index: 4, kind: input, shape index: {}]   ;;  %s2979_s5 = inlined_call_operand.hbm [shape: f32[256,16], index: 5, kind: input, shape index: {}]   ;;  %s2980_s6 = inlined_call_operand.hbm [shape: f32[9,32,1], index: 6, kind: input, shape index: {}]   ;;  %s2981_s7 = inlined_call_operand.vmem [shape: f32[9,16,16], index: 7, kind: input, shape index: {}]   ;;  %s2982_s8 = inlined_call_operand.vmem [shape: f32[1,16], index: 8, kind: input, shape index: {}]   ;;  %s2983_s9 = inlined_call_operand.vmem [shape: f32[9,16,3], index: 9, kind: input, shape index: {}]   ;;  %s2984_s10 = inlined_call_operand.vmem [shape: f32[1,3], index: 10, kind: input, shape index: {}]   ;;  %s2985_s11 = inlined_call_operand.vmem [shape: f32[32,3], index: 11, kind: output, shape index: {}]  }
   0x1   :  { %17 = vsyncpa [#allocation6], 0 }
   0x2   :  { %18 = vsyncpa [#allocation9], 0  ;;  %s42_s19 = sshll.u32 %s2978_s4, 4  ;;  %s2349_s20 = smov [#allocation5]   ;;  %s43_s19 = int_to_ptr.hbm [resolvable:$true] %s42_s19 }
   0x3   :  { %s44_s21 = sshll.u32 %s2349_s20, 4  ;;  %s25_s24 = sshll.u32 %s2975_s1, 4  ;;  %s45_s21 = int_to_ptr.vmem [resolvable:$true] %s44_s21  ;;  %s26_s24 = int_to_ptr.hbm [resolvable:$true] %s25_s24 }
   0x4   :  { %s2350_s25 = smov 256   ;;  %s2351_s26 = smov 16  }
   0x5   :  { %50 = dma.hbm_to_vmem [thread:$0]  %s43_s19, 1024, %s45_s21, [#allocation6], %s2350_s25, %s2350_s25, %s2351_s26  }
   0x6   :  { %s2352_s27 = smov [#allocation3]   ;;  %s55_s12 = sshll.u32 %s2979_s5, 4  ;;  %s56_s12 = int_to_ptr.hbm [resolvable:$true] %s55_s12 }
   0x7   :  { %s27_s28 = sshll.u32 %s2352_s27, 4  ;;  %s2353_s4 = smov [#allocation7]   ;;  %s28_s28 = int_to_ptr.vmem [resolvable:$true] %s27_s28 }
   0x8   :  { %33 = dma.hbm_to_vmem [thread:$0]  %s26_s24, 1024, %s28_s28, [#allocation4], %s2350_s25, %s2350_s25, %s2351_s26  }
   0x9   :  { %s57_s13 = sshll.u32 %s2353_s4, 4  ;;  %s68_s1 = sshll.u32 %s2980_s6, 4  ;;  %s58_s13 = int_to_ptr.vmem [resolvable:$true] %s57_s13  ;;  %s69_s1 = int_to_ptr.hbm [resolvable:$true] %s68_s1 }
   0xa   :  { %s2354_s16 = smov 128   ;;  %s2355_s17 = smov 8  }
   0xb   :  { %63 = dma.hbm_to_vmem [thread:$0]  %s56_s12, 4096, %s58_s13, [#allocation6], %s2354_s16, %s2354_s16, %s2355_s17  }
   0xc   :  { %s2356_s18 = smov [#allocation8]  }
   0xd   :  { %s70_s19 = sshll.u32 %s2356_s18, 4  ;;  %s71_s19 = int_to_ptr.vmem [resolvable:$true] %s70_s19 }
   0xe   :  { %76 = dma.hbm_to_vmem [thread:$0]  %s69_s1, 4608, %s71_s19, [#allocation9], %s2354_s16, %s2354_s16, %s2355_s17  }
   0xf   :  { %2343 = dma.done.wait [#allocation4], 1024  }
  0x10   :  { %2344 = vsyncadd [#allocation4], 4294966272 }
  0x11   :  { %2345 = dma.done.wait [#allocation6], 5120  }
  0x12   :  { %2346 = vsyncadd [#allocation6], 4294962176 }
  0x13   :  { %2347 = dma.done.wait [#allocation9], 4608  }
  0x14   :  { %2348 = vsyncadd [#allocation9], 4294962688  ;;  %v115_v0 = vld [vmem:[#allocation3 + $0x30] sm:$0xff]  ;;  %v116_v1 = vld [vmem:[#allocation3 + $0x38] sm:$0xff]  ;;  %vm123_vm0 = vcmask 261120   ;;  %vm184_vm1 = vcmask 1041408  }
  0x15   :  { %v113_v2 = vld [vmem:[#allocation3 + $0x20] sm:$0xff]  ;;  %139 = vmatpush.msra.mxu0 %v115_v0  ;;  %159 = vmatpush.msra.mxu1 %v116_v1  ;;  %v114_v3 = vld [vmem:[#allocation3 + $0x28] sm:$0xff]  ;;  %v111_v4 = vld [vmem:[#allocation3 + $0x10] sm:$0xff]  ;;  %vm171_vm2 = vcmask 15360   ;;  %v2357_v53 = vmov 0   ;;  %vm101_vm4 = vcmask 130048  }
  0x16   :  { %v112_v5 = vld [vmem:[#allocation3 + $0x18] sm:$0xff]  ;;  %v109_v6 = vld [vmem:[#allocation3] sm:$0xff]  ;;  %v110_v7 = vld [vmem:[#allocation3 + $0x8] sm:$0xff]  ;;  %2202 = vset.pattern.permute.xlu2 %v2357_v53  ;;  %2204 = vset.pattern.permute.xlu1 %v2357_v53 }
  0x17   :  { %140 = vmatpush.msra.mxu0 %v113_v2  ;;  %160 = vmatpush.msra.mxu1 %v114_v3  ;;  %v108_v8 = vld [vmem:[%s2974_s0] sm:$0x3]  ;;  %v280_v17 = vld [vmem:[#allocation7 + $0x78] sm:$0xff]  ;;  %v278_v21 = vld [vmem:[#allocation7 + $0x68] sm:$0xff] }
  0x18   :  { %v117_v9 = vld [vmem:[%s2976_s2] sm:$0x3]  ;;  %v296_v18 = vld [vmem:[#allocation7 + $0xf8] sm:$0xff]  ;;  %v294_v22 = vld [vmem:[#allocation7 + $0xe8] sm:$0xff]  ;;  %2203 = vset.pattern.permute.xlu0 %v2357_v53 }
  0x19   :  { %141 = vmatpush.msra.mxu0 %v111_v4  ;;  %161 = vmatpush.msra.mxu1 %v112_v5  ;;  %v119_v10 = vperm.slane %v117_v9, 0  ;;  %v120_v11 = vperm.slane %v117_v9, 1  ;;  %v167_v16 = vld [vmem:[%s2977_s3] sm:$0xff]  ;;  %v277_v23 = vld [vmem:[#allocation7 + $0x60] sm:$0xff]  ;;  %v168_v25 = vld [vmem:[%s2977_s3 + $0x8] sm:$0xff] }
  0x1a   :  { %v279_v19 = vld [vmem:[#allocation7 + $0x70] sm:$0xff]  ;;  %v293_v24 = vld [vmem:[#allocation7 + $0xe0] sm:$0xff]  ;;  %v276_v26 = vld [vmem:[#allocation7 + $0x58] sm:$0xff] }
  0x1b   :  { %142 = vmatpush.msra.mxu0 %v109_v6  ;;  %162 = vmatpush.msra.mxu1 %v110_v7  ;;  %v295_v20 = vld [vmem:[#allocation7 + $0xf0] sm:$0xff]  ;;  %v292_v27 = vld [vmem:[#allocation7 + $0xd8] sm:$0xff]  ;;  %v274_v30 = vld [vmem:[#allocation7 + $0x48] sm:$0xff] }
  0x1c   :  { %2068 = vmatmul.msk.f32.vlgmr.msra.gmra.mxu0 %vm123_vm0, %v108_v8  ;;  %2069 = vmatmul.msk.f32.vlgmr.msra.gmra.mxu1 %vm123_vm0, %v108_v8  ;;  %v275_v28 = vld [vmem:[#allocation7 + $0x50] sm:$0xff]  ;;  %v290_v31 = vld [vmem:[#allocation7 + $0xc8] sm:$0xff]  ;;  %v273_v32 = vld [vmem:[#allocation7 + $0x40] sm:$0xff] }
  0x1d   :  { %v291_v29 = vld [vmem:[#allocation7 + $0xd0] sm:$0xff]  ;;  %v289_v33 = vld [vmem:[#allocation7 + $0xc0] sm:$0xff]  ;;  %v272_v35 = vld [vmem:[#allocation7 + $0x38] sm:$0xff] }
  0x1e   :  { %v169_v34 = vld [vmem:[%s2977_s3 + $0x10] sm:$0xff]  ;;  %v288_v36 = vld [vmem:[#allocation7 + $0xb8] sm:$0xff]  ;;  %v271_v37 = vld [vmem:[#allocation7 + $0x30] sm:$0xff] }
  0x1f   :  { %v287_v38 = vld [vmem:[#allocation7 + $0xb0] sm:$0xff]  ;;  %v270_v39 = vld [vmem:[#allocation7 + $0x28] sm:$0xff]  ;;  %v269_v41 = vld [vmem:[#allocation7 + $0x20] sm:$0xff] }
  0x20   :  { %v286_v40 = vld [vmem:[#allocation7 + $0xa8] sm:$0xff]  ;;  %v285_v42 = vld [vmem:[#allocation7 + $0xa0] sm:$0xff]  ;;  %v268_v44 = vld [vmem:[#allocation7 + $0x18] sm:$0xff] }
  0x21   :  { %v170_v43 = vld [vmem:[%s2977_s3 + $0x18] sm:$0xff]  ;;  %v284_v45 = vld [vmem:[#allocation7 + $0x98] sm:$0xff]  ;;  %v267_v46 = vld [vmem:[#allocation7 + $0x10] sm:$0xff] }
  0x22   :  { %v283_v47 = vld [vmem:[#allocation7 + $0x90] sm:$0xff]  ;;  %v266_v48 = vld [vmem:[#allocation7 + $0x8] sm:$0xff]  ;;  %v265_v50 = vld [vmem:[#allocation7] sm:$0xff] }
  0x23   :  { %v282_v49 = vld [vmem:[#allocation7 + $0x88] sm:$0xff]  ;;  %v281_v51 = vld [vmem:[#allocation7 + $0x80] sm:$0xff]  ;;  %v251_v62 = vld [vmem:[#allocation5 + $0x10] sm:$0xff] }
  0x24   :  { %v2457_v52 = vld [vmem:[#allocation8 + $0x20] sm:$0xff]  ;;  %v250_v55 = vld [vmem:[#allocation5 + $0x8] sm:$0xff]  ;;  %v252_v63 = vld [vmem:[#allocation5 + $0x18] sm:$0xff] }
  0x25   :  { %484 = vperm.xlu2 %2202, %v2457_v52   ;;  %v249_v54 = vld [vmem:[#allocation5] sm:$0xff]  ;;  %v2463_v61 = vld [vmem:[#allocation8 + $0x8] sm:$0xff]  ;;  %v2466_v4 = vld [vmem:[#allocation8 + $0x30] sm:$0xff] }
  0x26   :  { %v2460_v60 = vld [vmem:[#allocation8] sm:$0xff]  ;;  %454 = vperm.xlu1 %2204, %v2463_v61   ;;  %v254_v6 = vld [vmem:[#allocation5 + $0x28] sm:$0xff] }
  0x27   :  { %v253_v5 = vld [vmem:[#allocation5 + $0x20] sm:$0xff] }
  0x2d   :  { %449 = vperm.xlu2 %2202, %v2460_v60  }
  0x35   :  { %494 = vperm.xlu2 %2202, %v2466_v4  }
  0x99   :  { %v144_v12 = vpop.f32.mrf.mxu0  ;;  %v164_v13 = vpop.f32.mrf.mxu1 }
  0x9a   :  { %v145_v14 = vadd.f32 %v144_v12, %v119_v10  ;;  %v165_v15 = vadd.f32 %v164_v13, %v120_v11  ;;  %v2469_v11 = vld [vmem:[#allocation8 + $0x10] sm:$0xff]  ;;  %v256_v13 = vld [vmem:[#allocation5 + $0x38] sm:$0xff] }
  0x9b   :  { %459 = vperm.xlu2 %2202, %v2469_v11   ;;  %v255_v12 = vld [vmem:[#allocation5 + $0x30] sm:$0xff] }
  0x9c   :  { %2070 = vmatpush.msk.msra.mxu2 %vm184_vm1, %v145_v14  ;;  %2075 = vmatpush.msk.msra.mxu3 %vm184_vm1, %v165_v15 }
  0x9d   :  { %2071 = vmatmul.msk.f32.vlgmr.msra.gmra.mxu2 %vm171_vm2, %v167_v16  ;;  %2076 = vmatmul.msk.f32.vlgmr.msra.gmra.mxu3 %vm171_vm2, %v167_v16 }
  0x9e   :  { %297 = vmatpush.msrb.mxu2 %v280_v17  ;;  %326 = vmatpush.msrb.mxu3 %v296_v18  ;;  %v2472_v18 = vld [vmem:[#allocation8 + $0x38] sm:$0xff] }
  0xa0   :  { %298 = vmatpush.msrb.mxu2 %v279_v19  ;;  %327 = vmatpush.msrb.mxu3 %v295_v20  ;;  %v2475_v19 = vld [vmem:[#allocation8 + $0x18] sm:$0xff]  ;;  %v2478_v20 = vld [vmem:[#allocation8 + $0x60] sm:$0xff] }
  0xa2   :  { %299 = vmatpush.msrb.mxu2 %v278_v21  ;;  %328 = vmatpush.msrb.mxu3 %v294_v22  ;;  %v2481_v21 = vld [vmem:[#allocation8 + $0x50] sm:$0xff]  ;;  %v2484_v22 = vld [vmem:[#allocation8 + $0x78] sm:$0xff] }
  0xa3   :  { %499 = vperm.xlu2 %2202, %v2472_v18  }
  0xa4   :  { %300 = vmatpush.msrb.mxu2 %v277_v23  ;;  %329 = vmatpush.msrb.mxu3 %v293_v24  ;;  %v2487_v23 = vld [vmem:[#allocation8 + $0xa8] sm:$0xff] }
  0xa5   :  { %2072 = vmatmul.msk.f32.gmra.mxu2 %vm171_vm2, %v168_v25  ;;  %2077 = vmatmul.msk.f32.gmra.mxu3 %vm171_vm2, %v168_v25  ;;  %v2490_v24 = vld [vmem:[#allocation8 + $0x108] sm:$0xff] }
  0xa6   :  { %301 = vmatpush.msrb.mxu2 %v276_v26  ;;  %330 = vmatpush.msrb.mxu3 %v292_v27  ;;  %v2493_v25 = vld [vmem:[#allocation8 + $0xe8] sm:$0xff] }
  0xa8   :  { %302 = vmatpush.msrb.mxu2 %v275_v28  ;;  %331 = vmatpush.msrb.mxu3 %v291_v29  ;;  %v2496_v29 = vld [vmem:[#allocation8 + $0xd0] sm:$0xff] }
  0xa9   :  { %2988 = vst [vmem:[#allocation13_spill] sm:$0xff] %v2496_v29 }
  0xaa   :  { %303 = vmatpush.msrb.mxu2 %v274_v30  ;;  %332 = vmatpush.msrb.mxu3 %v290_v31 }
  0xab   :  { %464 = vperm.xlu2 %2202, %v2475_v19  }
  0xac   :  { %304 = vmatpush.msrb.mxu2 %v273_v32  ;;  %333 = vmatpush.msrb.mxu3 %v289_v33 }
  0xad   :  { %2073 = vmatmul.msk.f32.gmra.mxu2 %vm171_vm2, %v169_v34  ;;  %2078 = vmatmul.msk.f32.gmra.mxu3 %vm171_vm2, %v169_v34 }
  0xae   :  { %305 = vmatpush.msrb.mxu2 %v272_v35  ;;  %334 = vmatpush.msrb.mxu3 %v288_v36 }
  0xb0   :  { %306 = vmatpush.msrb.mxu2 %v271_v37  ;;  %335 = vmatpush.msrb.mxu3 %v287_v38  ;;  %v2504_v37 = vld [vmem:[#allocation8 + $0xd8] sm:$0xff] }
  0xb2   :  { %307 = vmatpush.msrb.mxu2 %v270_v39  ;;  %336 = vmatpush.msrb.mxu3 %v286_v40 }
  0xb3   :  { %683 = vperm.xlu2 %2202, %v2478_v20  }
  0xb4   :  { %308 = vmatpush.msrb.mxu2 %v269_v41  ;;  %337 = vmatpush.msrb.mxu3 %v285_v42 }
  0xb5   :  { %2074 = vmatmul.msk.f32.gmra.mxu2 %vm171_vm2, %v170_v43  ;;  %2079 = vmatmul.msk.f32.gmra.mxu3 %vm171_vm2, %v170_v43 }
  0xb6   :  { %309 = vmatpush.msrb.mxu2 %v268_v44  ;;  %338 = vmatpush.msrb.mxu3 %v284_v45 }
  0xb8   :  { %310 = vmatpush.msrb.mxu2 %v267_v46  ;;  %339 = vmatpush.msrb.mxu3 %v283_v47 }
  0xba   :  { %311 = vmatpush.msrb.mxu2 %v266_v48  ;;  %340 = vmatpush.msrb.mxu3 %v282_v49 }
  0xbb   :  { %612 = vperm.xlu2 %2202, %v2481_v21  }
  0xbc   :  { %312 = vmatpush.msrb.mxu2 %v265_v50  ;;  %341 = vmatpush.msrb.mxu3 %v281_v51 }
  0xc3   :  { %698 = vperm.xlu2 %2202, %v2484_v22  }
  0xcb   :  { %821 = vperm.xlu2 %2202, %v2487_v23  }
  0xd3   :  { %1064 = vperm.xlu2 %2202, %v2490_v24  }
  0xdb   :  { %983 = vperm.xlu2 %2202, %v2493_v25  }
  0xe3   :  { %907 = vperm.xlu2 %2202, %v2496_v29  }
  0xeb   :  { %912 = vperm.xlu2 %2202, %v2504_v37  }
  0xf3   :  { %1275 = vperm.xlu2 %2202, %v2466_v4   ;;  %v2547_v4 = vld [vmem:[#allocation8 + $0xa0] sm:$0xff] }
 0x120   :  { %v208_v56 = vpop.f32.mrf.mxu2  ;;  %v237_v57 = vpop.f32.mrf.mxu3 }
 0x121   :  { %v257_v58 = vmul.f32 %v249_v54, %v208_v56  ;;  %v258_v59 = vmul.f32 %v250_v55, %v237_v57  ;;  %v479_v57 = vld [vmem:[#allocation8 + $0x28] sm:$0xff] }
 0x123   :  { %313 = vmatmul.f32.vlgmr.msrb.gmra.mxu2 %v257_v58  ;;  %342 = vmatmul.f32.vlgmr.msrb.gmra.mxu3 %v258_v59  ;;  %v2523_v58 = vld [vmem:[#allocation8 + $0x68] sm:$0xff]  ;;  %v2526_v59 = vld [vmem:[#allocation8 + $0x58] sm:$0xff] }
 0x128   :  { %v211_v0 = vpop.f32.mrf.mxu2  ;;  %v240_v1 = vpop.f32.mrf.mxu3 }
 0x129   :  { %v259_v2 = vmul.f32 %v251_v62, %v211_v0  ;;  %v260_v3 = vmul.f32 %v252_v63, %v240_v1  ;;  %v2529_v62 = vld [vmem:[#allocation8 + $0x40] sm:$0xff]  ;;  %v2535_v0 = vld [vmem:[#allocation8 + $0x48] sm:$0xff] }
 0x12a   :  { %v2532_v63 = vld [vmem:[#allocation8 + $0x100] sm:$0xff] }
 0x12b   :  { %316 = vmatmul.f32.gmra.mxu2 %v259_v2  ;;  %345 = vmatmul.f32.gmra.mxu3 %v260_v3  ;;  %v2538_v1 = vld [vmem:[#allocation8 + $0xe0] sm:$0xff]  ;;  %v2541_v2 = vld [vmem:[#allocation8 + $0x70] sm:$0xff]  ;;  %v2544_v3 = vld [vmem:[#allocation8 + $0xc8] sm:$0xff] }
 0x130   :  { %v214_v7 = vpop.f32.mrf.mxu2  ;;  %v243_v8 = vpop.f32.mrf.mxu3 }
 0x131   :  { %v261_v9 = vmul.f32 %v253_v5, %v214_v7  ;;  %v262_v10 = vmul.f32 %v254_v6, %v243_v8  ;;  %v2550_v5 = vld [vmem:[#allocation8 + $0xb8] sm:$0xff]  ;;  %v2552_v6 = vpop.permute.xlu2 %484  ;;  %v2555_v7 = vld [vmem:[#allocation8 + $0xc0] sm:$0xff] }
 0x132   :  { %v2558_v8 = vld [vmem:[#allocation8 + $0x118] sm:$0xff] }
 0x133   :  { %319 = vmatmul.f32.gmra.mxu2 %v261_v9  ;;  %348 = vmatmul.f32.gmra.mxu3 %v262_v10  ;;  %2989 = vst [vmem:[#allocation14_spill] sm:$0xff] %v2558_v8  ;;  %v2358_v9 = vmov 0.0  }
 0x134   :  { %102 = vst.msk [vmem:[#allocation2] sm:$0xff] %vm101_vm4, %v2358_v9 }
 0x135   :  { %103 = vst.msk [vmem:[#allocation2 + $0x8] sm:$0xff] %vm101_vm4, %v2358_v9 }
 0x136   :  { %104 = vst.msk [vmem:[#allocation2 + $0x10] sm:$0xff] %vm101_vm4, %v2358_v9 }
 0x137   :  { %105 = vst.msk [vmem:[#allocation2 + $0x18] sm:$0xff] %vm101_vm4, %v2358_v9 }
 0x138   :  { %v217_v14 = vpop.f32.mrf.mxu2  ;;  %v246_v15 = vpop.f32.mrf.mxu3  ;;  %106 = vst.msk [vmem:[#allocation2 + $0x20] sm:$0xff] %vm101_vm4, %v2358_v9 }
 0x139   :  { %v263_v16 = vmul.f32 %v255_v12, %v217_v14  ;;  %v264_v17 = vmul.f32 %v256_v13, %v246_v15  ;;  %v2562_v10 = vpop.permute.xlu2 %449  ;;  %v2567_v12 = vld [vmem:[#allocation8 + $0xb0] sm:$0xff]  ;;  %107 = vst.msk [vmem:[#allocation2 + $0x28] sm:$0xff] %vm101_vm4, %v2358_v9  ;;  %v2108_v9 = vld [vmem:[%s2981_s7 + $0x50] sm:$0xff] }
 0x13a   :  { %v2574_v14 = vld [vmem:[#allocation8 + $0x110] sm:$0xff] }
 0x13b   :  { %322 = vmatmul.f32.gmra.mxu2 %v263_v16  ;;  %351 = vmatmul.f32.gmra.mxu3 %v264_v17  ;;  %v2577_v15 = vld [vmem:[#allocation8 + $0xf0] sm:$0xff]  ;;  %v2582_v17 = vld [vmem:[#allocation8 + $0xf8] sm:$0xff] }
 0x141   :  { %v2572_v13 = vpop.permute.xlu2 %494 }
 0x149   :  { %v2579_v16 = vpop.permute.xlu2 %459 }
 0x1a6   :  { %v314_v26 = vpop.f32.mrf.mxu2  ;;  %v343_v27 = vpop.f32.mrf.mxu3 }
 0x1a7   :  { %v344_v28 = vadd.f32 %v343_v27, %v314_v26  ;;  %v2585_v26 = vpop.permute.xlu2 %499  ;;  %v2081_v27 = vld [vmem:[%s2981_s7 + $0x18] sm:$0xff] }
 0x1a8   :  { %535 = vmatpush.msrb.mxu0 %v2081_v27 }
 0x1a9   :  { %v359_v30 = vmul.f32 0.2, %v344_v28  ;;  %vm355_vm3 = vcmp.gt.f32.partialorder %v344_v28, 0.0 }
 0x1ab   :  { %v2499_v31 = vsel %vm355_vm3, %v344_v28, %v359_v30  ;;  %v472_v28 = vld [vmem:[%s2981_s7 + $0x8] sm:$0xff] }
 0x1ac   :  { %v367_v32 = vmul.f32 %v2499_v31, %v2499_v31  ;;  %576 = vmatpush.msrb.mxu1 %v472_v28 }
 0x1ae   :  { %v317_v33 = vpop.f32.mrf.mxu2  ;;  %v346_v34 = vpop.f32.mrf.mxu3  ;;  %v371_v35 = vsel %vm101_vm4, %v367_v32, 0.0 }
 0x1af   :  { %v347_v36 = vadd.f32 %v346_v34, %v317_v33  ;;  %372 = vadd.xlane.f32.xlu0 %v371_v35  ;;  %v2080_v33 = vld [vmem:[%s2981_s7 + $0x10] sm:$0xff]  ;;  %v471_v34 = vld [vmem:[%s2981_s7] sm:$0xff] }
 0x1b0   :  { %536 = vmatpush.msrb.mxu0 %v2080_v33  ;;  %577 = vmatpush.msrb.mxu1 %v471_v34 }
 0x1b1   :  { %vm356_vm5 = vcmp.gt.f32.partialorder %v347_v36, 0.0  ;;  %v360_v38 = vmul.f32 0.2, %v347_v36 }
 0x1b3   :  { %v2507_v39 = vsel %vm356_vm5, %v347_v36, %v360_v38  ;;  %v2602_v36 = vld [vmem:[%s2981_s7 + $0x48] sm:$0xff]  ;;  %v2608_v38 = vld [vmem:[%s2981_s7 + $0x40] sm:$0xff] }
 0x1b4   :  { %v368_v40 = vmul.f32 %v2507_v39, %v2507_v39  ;;  %2188 = vmatpush.msra.mxu2 %v2602_v36 }
 0x1b6   :  { %v320_v41 = vpop.f32.mrf.mxu2  ;;  %v349_v42 = vpop.f32.mrf.mxu3  ;;  %v374_v43 = vsel %vm101_vm4, %v368_v40, 0.0  ;;  %2189 = vmatpush.msra.mxu2 %v2608_v38 }
 0x1b7   :  { %v350_v44 = vadd.f32 %v349_v42, %v320_v41  ;;  %375 = vadd.xlane.f32.xlu0 %v374_v43  ;;  %v2610_v40 = vpop.permute.xlu1 %454  ;;  %v2613_v42 = vpop.permute.xlu2 %464 }
 0x1b9   :  { %vm357_vm6 = vcmp.gt.f32.partialorder %v350_v44, 0.0  ;;  %v361_v45 = vmul.f32 0.2, %v350_v44 }
 0x1bb   :  { %v2513_v46 = vsel %vm357_vm6, %v350_v44, %v361_v45 }
 0x1bc   :  { %v369_v47 = vmul.f32 %v2513_v46, %v2513_v46 }
 0x1be   :  { %v323_v48 = vpop.f32.mrf.mxu2  ;;  %v352_v49 = vpop.f32.mrf.mxu3  ;;  %v377_v50 = vsel %vm101_vm4, %v369_v47, 0.0 }
 0x1bf   :  { %v353_v51 = vadd.f32 %v352_v49, %v323_v48  ;;  %378 = vadd.xlane.f32.xlu1 %v377_v50  ;;  %v2627_v28 = vpop.permute.xlu2 %683 }
 0x1c1   :  { %vm358_vm7 = vcmp.gt.f32.partialorder %v353_v51, 0.0  ;;  %v362_v53 = vmul.f32 0.2, %v353_v51 }
 0x1c3   :  { %v2518_v54 = vsel %vm358_vm7, %v353_v51, %v362_v53  ;;  %v2109_v51 = vld [vmem:[%s2981_s7 + $0x58] sm:$0xff] }
 0x1c4   :  { %v370_v55 = vmul.f32 %v2518_v54, %v2518_v54  ;;  %2190 = vmatpush.msra.mxu3 %v2109_v51 }
 0x1c6   :  { %v380_v56 = vsel %vm101_vm4, %v370_v55, 0.0  ;;  %v2091_v55 = vld [vmem:[%s2981_s7 + $0x28] sm:$0xff]  ;;  %2191 = vmatpush.msra.mxu3 %v2108_v9 }
 0x1c7   :  { %381 = vadd.xlane.f32.xlu1 %v380_v56  ;;  %v2097_v56 = vld [vmem:[%s2981_s7 + $0x38] sm:$0xff]  ;;  %653 = vmatpush.msra.mxu0 %v2091_v55 }
 0x1c8   :  { %734 = vmatpush.msra.mxu1 %v2097_v56 }
 0x1cb   :  { %489 = vperm.xlu0 %2203, %v479_v57  }
 0x1d3   :  { %688 = vperm.xlu0 %2203, %v2523_v58  }
 0x1db   :  { %617 = vperm.xlu0 %2203, %v2526_v59  }
 0x1e0   :  { %602 = vperm.xlu1 %2204, %v2529_v62  }
 0x1e3   :  { %1059 = vperm.xlu0 %2203, %v2532_v63  }
 0x1e8   :  { %607 = vperm.xlu1 %2204, %v2535_v0  }
 0x1eb   :  { %978 = vperm.xlu0 %2203, %v2538_v1  }
 0x1f0   :  { %693 = vperm.xlu1 %2204, %v2541_v2  }
 0x1f3   :  { %902 = vperm.xlu0 %2203, %v2544_v3  }
 0x1f8   :  { %816 = vperm.xlu1 %2204, %v2547_v4  }
 0x1fb   :  { %831 = vperm.xlu0 %2203, %v2550_v5  }
 0x200   :  { %897 = vperm.xlu1 %2204, %v2555_v7  }
 0x203   :  { %1074 = vperm.xlu0 %2203, %v2558_v8  }
 0x208   :  { %826 = vperm.xlu1 %2204, %v2567_v12  }
 0x210   :  { %1069 = vperm.xlu1 %2204, %v2574_v14  }
 0x218   :  { %988 = vperm.xlu1 %2204, %v2577_v15  }
 0x220   :  { %993 = vperm.xlu1 %2204, %v2582_v17  }
 0x222   :  { %v373_v30 = vpop.xlane.xlu0 %372 }
 0x223   :  { %v383_v32 = vmul.f32 0.0625, %v373_v30 }
 0x225   :  { %v387_v35 = vadd.f32 1e-08, %v383_v32 }
 0x227   :  { %2207 = vrsqrt.f32 %v387_v35  ;;  %vm397_vm9 = vweird.f32 %v387_v35 }
 0x228   :  { %1270 = vperm.xlu1 %2204, %v479_v57  }
 0x22a   :  { %v376_v41 = vpop.xlane.xlu0 %375 }
 0x22b   :  { %v384_v43 = vmul.f32 0.0625, %v376_v41 }
 0x22d   :  { %v2208_v44 = vpop.eup %2207  ;;  %v388_v45 = vadd.f32 1e-08, %v384_v43 }
 0x22e   :  { %v392_v47 = vmul.f32 %v2208_v44, %v387_v35  ;;  %vm398_vm8 = vweird.f32 %v2208_v44  ;;  %v2096_v35 = vld [vmem:[%s2981_s7 + $0x30] sm:$0xff] }
 0x22f   :  { %2209 = vrsqrt.f32 %v388_v45  ;;  %vm399_vm10 = vmor %vm397_vm9, %vm398_vm8  ;;  %735 = vmatpush.msra.mxu1 %v2096_v35  ;;  %vm407_vm12 = vweird.f32 %v388_v45 }
 0x230   :  { %v393_v48 = vmul.f32 %v2208_v44, %v392_v47 }
 0x232   :  { %v394_v49 = vmul.f32 0.5, %v393_v48  ;;  %v379_v50 = vpop.xlane.xlu1 %378 }
 0x233   :  { %v385_v53 = vmul.f32 0.0625, %v379_v50  ;;  %v2090_v50 = vld [vmem:[%s2981_s7 + $0x20] sm:$0xff] }
 0x234   :  { %v395_v57 = vsub.f32 1.5, %v394_v49  ;;  %654 = vmatpush.msra.mxu0 %v2090_v50 }
 0x235   :  { %v2210_v27 = vpop.eup %2209  ;;  %v389_v30 = vadd.f32 1e-08, %v385_v53 }
 0x236   :  { %v396_v32 = vmul.f32 %v2208_v44, %v395_v57  ;;  %v402_v33 = vmul.f32 %v2210_v27, %v388_v45  ;;  %vm408_vm11 = vweird.f32 %v2210_v27  ;;  %v2127_v57 = vld [vmem:[%s2981_s7 + $0x88] sm:$0xff] }
 0x237   :  { %2211 = vrsqrt.f32 %v389_v30  ;;  %vm409_vm13 = vmor %vm407_vm12, %vm408_vm11  ;;  %1110 = vmatpush.msrb.mxu2 %v2127_v57  ;;  %vm417_vm15 = vweird.f32 %v389_v30 }
 0x238   :  { %v400_v34 = vsel %vm399_vm10, %v2208_v44, %v396_v32  ;;  %v403_v41 = vmul.f32 %v2210_v27, %v402_v33  ;;  %v2126_v32 = vld [vmem:[%s2981_s7 + $0x80] sm:$0xff]  ;;  %v2643_v33 = vpop.permute.xlu2 %612 }
 0x239   :  { %v431_v43 = vmul.f32 %v400_v34, %v2499_v31  ;;  %1111 = vmatpush.msrb.mxu2 %v2126_v32 }
 0x23a   :  { %v404_v47 = vmul.f32 0.5, %v403_v41  ;;  %v382_v48 = vpop.xlane.xlu1 %381 }
 0x23b   :  { %435 = vst.msk [vmem:[#allocation2 + $0x8] sm:$0xff] %vm101_vm4, %v431_v43  ;;  %v386_v49 = vmul.f32 0.0625, %v382_v48 }
 0x23c   :  { %v405_v53 = vsub.f32 1.5, %v404_v47 }
 0x23d   :  { %v2212_v44 = vpop.eup %2211  ;;  %v390_v55 = vadd.f32 1e-08, %v386_v49  ;;  %v490_v43 = vpop.permute.xlu0 %489 }
 0x23e   :  { %v406_v31 = vmul.f32 %v2210_v27, %v405_v53  ;;  %v412_v56 = vmul.f32 %v2212_v44, %v389_v30  ;;  %vm418_vm14 = vweird.f32 %v2212_v44 }
 0x23f   :  { %2213 = vrsqrt.f32 %v390_v55  ;;  %vm419_vm0 = vmor %vm417_vm15, %vm418_vm14  ;;  %vm427_vm2 = vweird.f32 %v390_v55 }
 0x240   :  { %v410_v34 = vsel %vm409_vm13, %v2210_v27, %v406_v31  ;;  %v413_v41 = vmul.f32 %v2212_v44, %v412_v56 }
 0x241   :  { %v432_v47 = vmul.f32 %v410_v34, %v2507_v39 }
 0x242   :  { %v414_v45 = vmul.f32 0.5, %v413_v41  ;;  %v473_v48 = vld [vmem:[#allocation2 + $0x4] sm:$0xff] }
 0x243   :  { %v439_v49 = vld [vmem:[#allocation2 + $0x3] sm:$0xff]  ;;  %436 = vst.msk [vmem:[#allocation2 + $0x10] sm:$0xff] %vm101_vm4, %v432_v47  ;;  %v502_v50 = vmul.f32 %v2552_v6, %v473_v48  ;;  %v2653_v6 = vpop.permute.xlu2 %698 }
 0x244   :  { %v467_v35 = vmul.f32 %v2562_v10, %v439_v49  ;;  %v415_v53 = vsub.f32 1.5, %v414_v45 }
 0x245   :  { %v2214_v8 = vpop.eup %2213  ;;  %2082 = vmatmul.msk.f32.vlgmr.msrb.gmra.mxu0 %vm101_vm4, %v502_v50  ;;  %v2658_v34 = vpop.permute.xlu0 %688 }
 0x246   :  { %2086 = vmatmul.msk.f32.vlgmr.msrb.gmra.mxu1 %vm101_vm4, %v467_v35  ;;  %v416_v27 = vmul.f32 %v2212_v44, %v415_v53  ;;  %v422_v39 = vmul.f32 %v2214_v8, %v390_v55  ;;  %786 = vmatpush.msrb.mxu0 %v2602_v36  ;;  %vm428_vm1 = vweird.f32 %v2214_v8 }
 0x247   :  { %867 = vmatpush.msrb.mxu1 %v2109_v51  ;;  %vm429_vm3 = vmor %vm427_vm2, %vm428_vm1 }
 0x248   :  { %v420_v31 = vsel %vm419_vm0, %v2212_v44, %v416_v27  ;;  %v423_v56 = vmul.f32 %v2214_v8, %v422_v39  ;;  %787 = vmatpush.msrb.mxu0 %v2608_v38 }
 0x249   :  { %868 = vmatpush.msrb.mxu1 %v2108_v9  ;;  %v433_v10 = vmul.f32 %v420_v31, %v2513_v46 }
 0x24a   :  { %v424_v57 = vmul.f32 0.5, %v423_v56  ;;  %v2656_v32 = vld [vmem:[#allocation2 + $0xc] sm:$0xff] }
 0x24b   :  { %v754_v30 = vld [vmem:[#allocation2 + $0x10] sm:$0xff]  ;;  %437 = vst.msk [vmem:[#allocation2 + $0x18] sm:$0xff] %vm101_vm4, %v433_v10  ;;  %v503_v36 = vmul.f32 %v490_v43, %v2656_v32  ;;  %v822_v49 = vpop.permute.xlu2 %821 }
 0x24c   :  { %2105 = vmatmul.msk.f32.vlgmr.msra.gmra.mxu2 %vm101_vm4, %v754_v30  ;;  %v2663_v51 = vld [vmem:[#allocation2 + $0xb] sm:$0xff]  ;;  %v425_v38 = vsub.f32 1.5, %v424_v57 }
 0x24d   :  { %v468_v9 = vmul.f32 %v2610_v40, %v2663_v51  ;;  %2083 = vmatmul.msk.f32.gmra.mxu0 %vm101_vm4, %v503_v36  ;;  %v618_v50 = vpop.permute.xlu0 %617  ;;  %v1048_v56 = vld [vmem:[#allocation2 + $0xd] sm:$0xff]  ;;  %v591_v30 = vld [vmem:[#allocation2 + $0x5] sm:$0xff] }
 0x24e   :  { %v426_v46 = vmul.f32 %v2214_v8, %v425_v38  ;;  %v672_v57 = vld [vmem:[#allocation2 + $0x7] sm:$0xff] }
 0x24f   :  { %2087 = vmatmul.msk.f32.gmra.mxu1 %vm101_vm4, %v468_v9 }
 0x250   :  { %v430_v44 = vsel %vm429_vm3, %v2214_v8, %v426_v46  ;;  %v2121_v46 = vld [vmem:[%s2981_s7 + $0x78] sm:$0xff] }
 0x251   :  { %v434_v41 = vmul.f32 %v430_v44, %v2518_v54  ;;  %v2114_v44 = vld [vmem:[%s2981_s7 + $0x60] sm:$0xff] }
 0x252   :  { %v603_v43 = vpop.permute.xlu1 %602  ;;  %v755_v47 = vld [vmem:[#allocation2 + $0x18] sm:$0xff] }
 0x253   :  { %v2670_v45 = vld [vmem:[#allocation2 + $0x14] sm:$0xff]  ;;  %438 = vst.msk [vmem:[#allocation2 + $0x20] sm:$0xff] %vm101_vm4, %v434_v41  ;;  %v620_v38 = vmul.f32 %v603_v43, %v591_v30 }
 0x254   :  { %v2672_v48 = vld [vmem:[#allocation2 + $0x13] sm:$0xff]  ;;  %2106 = vmatmul.msk.f32.gmra.mxu2 %vm101_vm4, %v755_v47  ;;  %v504_v40 = vmul.f32 %v2572_v13, %v2670_v45 }
 0x255   :  { %v469_v55 = vmul.f32 %v2579_v16, %v2672_v48  ;;  %v806_v8 = vld [vmem:[#allocation2 + $0x11] sm:$0xff]  ;;  %v1060_v31 = vpop.permute.xlu0 %1059 }
 0x256   :  { %v835_v54 = vmul.f32 %v822_v49, %v806_v8  ;;  %2084 = vmatmul.msk.f32.gmra.mxu0 %vm101_vm4, %v504_v40  ;;  %v1077_v10 = vmul.f32 %v1060_v31, %v1048_v56  ;;  %v1049_v9 = vld [vmem:[#allocation2 + $0x15] sm:$0xff] }
 0x257   :  { %2088 = vmatmul.msk.f32.gmra.mxu1 %vm101_vm4, %v469_v55  ;;  %v673_v41 = vld [vmem:[#allocation2 + $0xf] sm:$0xff] }
 0x258   :  { %2111 = vmatmul.msk.f32.vlgmr.msra.gmra.mxu3 %vm101_vm4, %v835_v54  ;;  %v2120_v55 = vld [vmem:[%s2981_s7 + $0x70] sm:$0xff]  ;;  %v702_v8 = vmul.f32 %v2658_v34, %v673_v41 }
 0x25a   :  { %v608_v35 = vpop.permute.xlu1 %607  ;;  %v756_v53 = vld [vmem:[#allocation2 + $0x20] sm:$0xff] }
 0x25b   :  { %v2683_v27 = vld [vmem:[#allocation2 + $0x1c] sm:$0xff]  ;;  %v621_v49 = vmul.f32 %v1048_v56, %v608_v35  ;;  %v1051_v41 = vld [vmem:[#allocation2 + $0x25] sm:$0xff] }
 0x25c   :  { %2107 = vmatmul.msk.f32.gmra.mxu2 %vm101_vm4, %v756_v53  ;;  %v505_v13 = vmul.f32 %v2585_v26, %v2683_v27  ;;  %v2688_v39 = vld [vmem:[#allocation2 + $0x1b] sm:$0xff]  ;;  %v701_v26 = vmul.f32 %v2627_v28, %v672_v57  ;;  %v1065_v28 = vpop.permute.xlu2 %1064 }
 0x25d   :  { %v470_v16 = vmul.f32 %v2613_v42, %v2688_v39  ;;  %v2115_v42 = vld [vmem:[%s2981_s7 + $0x68] sm:$0xff]  ;;  %v1078_v43 = vmul.f32 %v1065_v28, %v1049_v9  ;;  %v979_v40 = vpop.permute.xlu0 %978  ;;  %v674_v53 = vld [vmem:[#allocation2 + $0x17] sm:$0xff]  ;;  %v675_v56 = vld [vmem:[#allocation2 + $0x1f] sm:$0xff] }
 0x25e   :  { %2085 = vmatmul.msk.f32.gmra.mxu0 %vm101_vm4, %v505_v13  ;;  %v622_v13 = vmul.f32 %v1049_v9, %v2643_v33  ;;  %v594_v31 = vld [vmem:[#allocation2 + $0x1d] sm:$0xff]  ;;  %v805_v9 = vld [vmem:[#allocation2 + $0x9] sm:$0xff] }
 0x25f   :  { %2089 = vmatmul.msk.f32.gmra.mxu1 %vm101_vm4, %v470_v16  ;;  %v807_v57 = vld [vmem:[#allocation2 + $0x19] sm:$0xff]  ;;  %v623_v34 = vmul.f32 %v618_v50, %v594_v31  ;;  %v753_v28 = vld [vmem:[#allocation2 + $0x8] sm:$0xff] }
 0x262   :  { %v694_v36 = vpop.permute.xlu1 %693 }
 0x263   :  { %v703_v16 = vmul.f32 %v694_v36, %v674_v53  ;;  %v808_v36 = vld [vmem:[#allocation2 + $0x21] sm:$0xff] }
 0x264   :  { %2128 = vmatmul.msk.f32.vlgmr.msrb.gmra.mxu2 %vm101_vm4, %v1077_v10  ;;  %v889_v53 = vld [vmem:[#allocation2 + $0x23] sm:$0xff] }
 0x265   :  { %v903_v35 = vpop.permute.xlu0 %902 }
 0x266   :  { %2092 = vmatmul.msk.f32.vlgmr.msra.gmra.mxu0 %vm101_vm4, %v620_v38  ;;  %v704_v38 = vmul.f32 %v2653_v6, %v675_v56 }
 0x267   :  { %2098 = vmatmul.msk.f32.vlgmr.msra.gmra.mxu1 %vm101_vm4, %v701_v26  ;;  %948 = vmatpush.msra.mxu0 %v2115_v42 }
 0x268   :  { %1029 = vmatpush.msra.mxu1 %v2121_v46 }
 0x269   :  { %949 = vmatpush.msra.mxu0 %v2114_v44 }
 0x26a   :  { %v817_v47 = vpop.permute.xlu1 %816  ;;  %1030 = vmatpush.msra.mxu1 %v2120_v55  ;;  %v984_v55 = vpop.permute.xlu2 %983 }
 0x26b   :  { %v834_v44 = vmul.f32 %v817_v47, %v805_v9  ;;  %v916_v47 = vmul.f32 %v903_v35, %v2672_v48  ;;  %v970_v48 = vld [vmem:[#allocation2 + $0x24] sm:$0xff] }
 0x26c   :  { %2129 = vmatmul.msk.f32.gmra.mxu2 %vm101_vm4, %v1078_v43  ;;  %v996_v43 = vmul.f32 %v979_v40, %v2656_v32 }
 0x26d   :  { %v832_v33 = vpop.permute.xlu0 %831 }
 0x26e   :  { %2093 = vmatmul.msk.f32.gmra.mxu0 %vm101_vm4, %v621_v49  ;;  %v837_v42 = vmul.f32 %v832_v33, %v808_v36 }
 0x26f   :  { %2099 = vmatmul.msk.f32.gmra.mxu1 %vm101_vm4, %v702_v8  ;;  %v997_v8 = vmul.f32 %v984_v55, %v2670_v45 }
 0x272   :  { %v898_v54 = vpop.permute.xlu1 %897 }
 0x273   :  { %v915_v50 = vmul.f32 %v898_v54, %v2663_v51  ;;  %v908_v54 = vpop.permute.xlu2 %907 }
 0x274   :  { %v917_v32 = vmul.f32 %v908_v54, %v2688_v39 }
 0x275   :  { %v1075_v6 = vpop.permute.xlu0 %1074 }
 0x276   :  { %2094 = vmatmul.msk.f32.gmra.mxu0 %vm101_vm4, %v622_v13  ;;  %v1080_v49 = vmul.f32 %v1075_v6, %v1051_v41 }
 0x277   :  { %2100 = vmatmul.msk.f32.gmra.mxu1 %vm101_vm4, %v703_v16 }
 0x27a   :  { %v827_v10 = vpop.permute.xlu1 %826 }
 0x27b   :  { %v836_v30 = vmul.f32 %v827_v10, %v807_v57  ;;  %v913_v16 = vpop.permute.xlu2 %912 }
 0x27c   :  { %v918_v35 = vmul.f32 %v913_v16, %v889_v53 }
 0x27d   :  { %2112 = vmatmul.msk.f32.gmra.mxu3 %vm101_vm4, %v836_v30 }
 0x27e   :  { %2095 = vmatmul.msk.f32.gmra.mxu0 %vm101_vm4, %v623_v34 }
 0x27f   :  { %2101 = vmatmul.msk.f32.gmra.mxu1 %vm101_vm4, %v704_v38 }
 0x282   :  { %v1070_v26 = vpop.permute.xlu1 %1069 }
 0x283   :  { %v1079_v46 = vmul.f32 %v1070_v26, %v594_v31 }
 0x285   :  { %2113 = vmatmul.msk.f32.gmra.mxu3 %vm101_vm4, %v837_v42  ;;  %2130 = vmatmul.msk.f32.gmra.mxu2 %vm101_vm4, %v1079_v46 }
 0x286   :  { %2104 = vmatmul.msk.f32.vlgmr.msrb.gmra.mxu0 %vm101_vm4, %v753_v28 }
 0x287   :  { %2110 = vmatmul.msk.f32.vlgmr.msrb.gmra.mxu1 %vm101_vm4, %v834_v44 }
 0x28a   :  { %v989_v51 = vpop.permute.xlu1 %988 }
 0x28b   :  { %v998_v40 = vmul.f32 %v989_v51, %v2683_v27 }
 0x28d   :  { %2131 = vmatmul.msk.f32.gmra.mxu2 %vm101_vm4, %v1080_v49 }
 0x28e   :  { %2116 = vmatmul.msk.f32.vlgmr.msra.gmra.mxu0 %vm101_vm4, %v915_v50 }
 0x28f   :  { %2122 = vmatmul.msk.f32.vlgmr.msra.gmra.mxu1 %vm101_vm4, %v996_v43 }
 0x292   :  { %v994_v13 = vpop.permute.xlu1 %993 }
 0x293   :  { %v999_v45 = vmul.f32 %v994_v13, %v970_v48 }
 0x296   :  { %2117 = vmatmul.msk.f32.gmra.mxu0 %vm101_vm4, %v916_v47 }
 0x297   :  { %2123 = vmatmul.msk.f32.gmra.mxu1 %vm101_vm4, %v997_v8 }
 0x29e   :  { %2118 = vmatmul.msk.f32.gmra.mxu0 %vm101_vm4, %v917_v32 }
 0x29f   :  { %2124 = vmatmul.msk.f32.gmra.mxu1 %vm101_vm4, %v998_v40 }
 0x2a6   :  { %2119 = vmatmul.msk.f32.gmra.mxu0 %vm101_vm4, %v918_v35 }
 0x2a7   :  { %2125 = vmatmul.msk.f32.gmra.mxu1 %vm101_vm4, %v999_v45 }
 0x2c2   :  { %v538_v31 = vpop.f32.mrf.mxu0 }
 0x2c3   :  { %v579_v56 = vpop.f32.mrf.mxu1 }
 0x2c4   :  { %v580_v43 = vadd.f32 %v579_v56, %v538_v31  ;;  %v2205_v56 = vld [vmem:[%s2982_s8] ss:$0 sm:$0xff] }
 0x2ca   :  { %v541_v10 = vpop.f32.mrf.mxu0 }
 0x2cc   :  { %v582_v39 = vpop.f32.mrf.mxu1 }
 0x2cd   :  { %v583_v54 = vadd.f32 %v582_v39, %v541_v10 }
 0x2cf   :  { %v792_v26 = vpop.f32.mrf.mxu2 }
 0x2d3   :  { %v544_v57 = vpop.f32.mrf.mxu0 }
 0x2d4   :  { %v585_v27 = vpop.f32.mrf.mxu1 }
 0x2d7   :  { %v795_v28 = vpop.f32.mrf.mxu2 }
 0x2db   :  { %v547_v34 = vpop.f32.mrf.mxu0  ;;  %v873_v29 = vpop.f32.mrf.mxu3 }
 0x2dc   :  { %v588_v30 = vpop.f32.mrf.mxu1 }
 0x2dd   :  { %v589_v38 = vadd.f32 %v588_v30, %v547_v34 }
 0x2df   :  { %v798_v55 = vpop.f32.mrf.mxu2 }
 0x2e3   :  { %v656_v33 = vpop.f32.mrf.mxu0 }
 0x2e4   :  { %v737_v36 = vpop.f32.mrf.mxu1  ;;  %v668_v47 = vadd.f32 %v656_v33, %v580_v43 }
 0x2e6   :  { %v749_v32 = vadd.f32 %v737_v36, %v668_v47 }
 0x2e7   :  { %v1113_v35 = vpop.f32.mrf.mxu2 }
 0x2eb   :  { %v659_v9 = vpop.f32.mrf.mxu0 }
 0x2ec   :  { %v740_v42 = vpop.f32.mrf.mxu1  ;;  %v669_v53 = vadd.f32 %v659_v9, %v583_v54 }
 0x2ee   :  { %v750_v16 = vadd.f32 %v740_v42, %v669_v53 }
 0x2f3   :  { %v662_v46 = vpop.f32.mrf.mxu0 }
 0x2f4   :  { %v743_v44 = vpop.f32.mrf.mxu1 }
 0x2fb   :  { %v665_v6 = vpop.f32.mrf.mxu0 }
 0x2fc   :  { %v671_v50 = vadd.f32 %v665_v6, %v589_v38  ;;  %v746_v41 = vpop.f32.mrf.mxu1  ;;  %v586_v38 = vadd.f32 %v585_v27, %v544_v57  ;;  %v802_v6 = vadd.f32 %v792_v26, %v750_v16 }
 0x2fe   :  { %v752_v49 = vadd.f32 %v746_v41, %v671_v50  ;;  %v670_v33 = vadd.f32 %v662_v46, %v586_v38  ;;  %v883_v36 = vadd.f32 %v873_v29, %v802_v6 }
 0x300   :  { %v804_v8 = vadd.f32 %v798_v55, %v752_v49  ;;  %v751_v50 = vadd.f32 %v743_v44, %v670_v33  ;;  %v1116_v49 = vpop.f32.mrf.mxu2  ;;  %v876_v55 = vpop.f32.mrf.mxu3 }
 0x302   :  { %v803_v26 = vadd.f32 %v795_v28, %v751_v50 }
 0x303   :  { %v789_v51 = vpop.f32.mrf.mxu0 }
 0x304   :  { %v870_v40 = vpop.f32.mrf.mxu1  ;;  %v801_v13 = vadd.f32 %v789_v51, %v749_v32  ;;  %v884_v54 = vadd.f32 %v876_v55, %v803_v26 }
 0x306   :  { %v882_v48 = vadd.f32 %v870_v40, %v801_v13 }
 0x308   :  { %v1119_v13 = vpop.f32.mrf.mxu2 }
 0x30b   :  { %v951_v45 = vpop.f32.mrf.mxu0 }
 0x30c   :  { %v963_v34 = vadd.f32 %v951_v45, %v882_v48  ;;  %v1032_v30 = vpop.f32.mrf.mxu1 }
 0x30e   :  { %v1044_v31 = vadd.f32 %v1032_v30, %v963_v34 }
 0x310   :  { %v1125_v10 = vadd.f32 %v1113_v35, %v1044_v31  ;;  %v879_v35 = vpop.f32.mrf.mxu3 }
 0x311   :  { %v885_v30 = vadd.f32 %v879_v35, %v804_v8 }
 0x312   :  { %v1133_v39 = vadd.f32 %v2205_v56, %v1125_v10 }
 0x313   :  { %v954_v9 = vpop.f32.mrf.mxu0 }
 0x314   :  { %v964_v42 = vadd.f32 %v954_v9, %v883_v36  ;;  %v1035_v41 = vpop.f32.mrf.mxu1  ;;  %vm1137_vm5 = vcmp.gt.f32.partialorder %v1133_v39, 0.0  ;;  %v1141_v43 = vmul.f32 0.2, %v1133_v39  ;;  %v1122_v9 = vpop.f32.mrf.mxu2 }
 0x316   :  { %v1045_v47 = vadd.f32 %v1035_v41, %v964_v42  ;;  %v2743_v57 = vsel %vm1137_vm5, %v1133_v39, %v1141_v43 }
 0x317   :  { %v1149_v27 = vmul.f32 %v2743_v57, %v2743_v57 }
 0x318   :  { %v1126_v51 = vadd.f32 %v1116_v49, %v1045_v47 }
 0x319   :  { %v1153_v46 = vsel %vm101_vm4, %v1149_v27, 0.0 }
 0x31a   :  { %v1134_v29 = vadd.f32 %v2205_v56, %v1126_v51  ;;  %1154 = vadd.xlane.f32.xlu0 %v1153_v46 }
 0x31b   :  { %v957_v44 = vpop.f32.mrf.mxu0 }
 0x31c   :  { %v965_v32 = vadd.f32 %v957_v44, %v884_v54  ;;  %v1038_v40 = vpop.f32.mrf.mxu1  ;;  %vm1138_vm6 = vcmp.gt.f32.partialorder %v1134_v29, 0.0  ;;  %v1142_v53 = vmul.f32 0.2, %v1134_v29 }
 0x31e   :  { %v1046_v16 = vadd.f32 %v1038_v40, %v965_v32  ;;  %v2748_v48 = vsel %vm1138_vm6, %v1134_v29, %v1142_v53 }
 0x31f   :  { %v1150_v45 = vmul.f32 %v2748_v48, %v2748_v48 }
 0x320   :  { %v1127_v28 = vadd.f32 %v1119_v13, %v1046_v16  ;;  %v2990_v16 = vld [vmem:[#allocation13_spill] sm:$0xff] }
 0x321   :  { %v1156_v34 = vsel %vm101_vm4, %v1150_v45, 0.0 }
 0x322   :  { %v1135_v38 = vadd.f32 %v2205_v56, %v1127_v28  ;;  %1157 = vadd.xlane.f32.xlu2 %v1156_v34 }
 0x323   :  { %v960_v6 = vpop.f32.mrf.mxu0 }
 0x324   :  { %v966_v31 = vadd.f32 %v960_v6, %v885_v30  ;;  %vm1139_vm7 = vcmp.gt.f32.partialorder %v1135_v38, 0.0  ;;  %v1143_v33 = vmul.f32 0.2, %v1135_v38  ;;  %v1041_v10 = vpop.f32.mrf.mxu1 }
 0x326   :  { %v1047_v39 = vadd.f32 %v1041_v10, %v966_v31  ;;  %v2753_v36 = vsel %vm1139_vm7, %v1135_v38, %v1143_v33 }
 0x327   :  { %v1151_v50 = vmul.f32 %v2753_v36, %v2753_v36 }
 0x328   :  { %v1128_v42 = vadd.f32 %v1122_v9, %v1047_v39  ;;  %v2991_v39 = vld [vmem:[#allocation14_spill] sm:$0xff] }
 0x329   :  { %v1159_v41 = vsel %vm101_vm4, %v1151_v50, 0.0 }
 0x32a   :  { %v1136_v43 = vadd.f32 %v2205_v56, %v1128_v42  ;;  %1160 = vadd.xlane.f32.xlu1 %v1159_v41 }
 0x32c   :  { %v1144_v8 = vmul.f32 0.2, %v1136_v43  ;;  %vm1140_vm8 = vcmp.gt.f32.partialorder %v1136_v43, 0.0 }
 0x32e   :  { %1265 = vperm.xlu0 %2203, %v2457_v52   ;;  %v2769_v52 = vsel %vm1140_vm8, %v1136_v43, %v1144_v8 }
 0x336   :  { %1280 = vperm.xlu0 %2203, %v2472_v18  }
 0x33a   :  { %1382 = vperm.xlu2 %2202, %v2529_v62  }
 0x33e   :  { %1231 = vperm.xlu0 %2203, %v2460_v60   ;;  %v1152_v60 = vmul.f32 %v2769_v52, %v2769_v52 }
 0x343   :  { %1462 = vperm.xlu1 %2204, %v2478_v20   ;;  %v2133_v20 = vld [vmem:[%s2983_s9 + $0x18] sm:$0xff] }
 0x344   :  { %1316 = vmatpush.msrb.mxu3 %v2133_v20 }
 0x346   :  { %1236 = vperm.xlu0 %2203, %v2463_v61   ;;  %v1162_v61 = vsel %vm101_vm4, %v1152_v60, 0.0 }
 0x34b   :  { %1467 = vperm.xlu1 %2204, %v2523_v58   ;;  %v1253_v58 = vld [vmem:[%s2983_s9] sm:$0xff] }
 0x34e   :  { %1241 = vperm.xlu0 %2203, %v2469_v11   ;;  %v2788_v11 = vpop.permute.xlu2 %1275 }
 0x353   :  { %1472 = vperm.xlu1 %2204, %v2541_v2   ;;  %v2148_v2 = vld [vmem:[%s2983_s9 + $0x30] sm:$0xff] }
 0x356   :  { %1246 = vperm.xlu0 %2203, %v2475_v19  }
 0x35b   :  { %1477 = vperm.xlu1 %2204, %v2484_v22   ;;  %v2143_v22 = vld [vmem:[%s2983_s9 + $0x28] sm:$0xff] }
 0x35c   :  { %1433 = vmatpush.msrb.mxu1 %v2143_v22 }
 0x35e   :  { %1594 = vperm.xlu0 %2203, %v2547_v4  }
 0x363   :  { %1754 = vperm.xlu1 %2204, %v2538_v1   ;;  %1163 = vadd.xlane.f32.xlu2 %v1162_v61  ;;  %v2149_v1 = vld [vmem:[%s2983_s9 + $0x38] sm:$0xff] }
 0x364   :  { %1513 = vmatpush.msra.mxu2 %v2149_v1 }
 0x366   :  { %1759 = vperm.xlu0 %2203, %v2493_v25   ;;  %v2142_v25 = vld [vmem:[%s2983_s9 + $0x20] sm:$0xff]  ;;  %1514 = vmatpush.msra.mxu2 %v2148_v2 }
 0x367   :  { %1434 = vmatpush.msrb.mxu1 %v2142_v25  ;;  %v2154_v2 = vld [vmem:[%s2983_s9 + $0x40] sm:$0xff] }
 0x36b   :  { %1674 = vperm.xlu1 %2204, %v2555_v7  }
 0x36e   :  { %1679 = vperm.xlu0 %2203, %v2544_v3  }
 0x373   :  { %1839 = vperm.xlu1 %2204, %v2490_v24  }
 0x376   :  { %1844 = vperm.xlu0 %2203, %v2574_v14  }
 0x37b   :  { %1604 = vperm.xlu1 %2204, %v2567_v12   ;;  %1387 = vperm.xlu2 %2202, %v2535_v0  }
 0x37e   :  { %1609 = vperm.xlu0 %2203, %v2550_v5  }
 0x383   :  { %1769 = vperm.xlu1 %2204, %v2582_v17   ;;  %1392 = vperm.xlu2 %2202, %v2481_v21   ;;  %v2132_v21 = vld [vmem:[%s2983_s9 + $0x10] sm:$0xff] }
 0x384   :  { %1317 = vmatpush.msrb.mxu3 %v2132_v21 }
 0x38b   :  { %1689 = vperm.xlu1 %2204, %v2504_v37   ;;  %1397 = vperm.xlu2 %2202, %v2526_v59   ;;  %v1254_v37 = vld [vmem:[%s2983_s9 + $0x8] sm:$0xff]  ;;  %v2809_v59 = vpop.permute.xlu1 %1270 }
 0x38c   :  { %1357 = vmatpush.msrb.mxu0 %v1254_v37 }
 0x38d   :  { %v1155_v18 = vpop.xlane.xlu0 %1154 }
 0x38e   :  { %v1165_v19 = vmul.f32 0.0625, %v1155_v18  ;;  %1358 = vmatpush.msrb.mxu0 %v1253_v58 }
 0x390   :  { %v1169_v24 = vadd.f32 1e-08, %v1165_v19 }
 0x392   :  { %2215 = vrsqrt.f32 %v1169_v24  ;;  %vm1179_vm10 = vweird.f32 %v1169_v24 }
 0x393   :  { %1834 = vperm.xlu2 %2202, %v2532_v63  }
 0x395   :  { %v1158_v62 = vpop.xlane.xlu2 %1157 }
 0x396   :  { %v1166_v0 = vmul.f32 0.0625, %v1158_v62 }
 0x398   :  { %v2216_v63 = vpop.eup %2215  ;;  %v1170_v3 = vadd.f32 1e-08, %v1166_v0 }
 0x399   :  { %v1174_v4 = vmul.f32 %v2216_v63, %v1169_v24  ;;  %vm1180_vm9 = vweird.f32 %v2216_v63 }
 0x39a   :  { %2217 = vrsqrt.f32 %v1170_v3  ;;  %vm1181_vm11 = vmor %vm1179_vm10, %vm1180_vm9  ;;  %vm1189_vm13 = vweird.f32 %v1170_v3  ;;  %vm1992_vm9 = vcmask 23552  }
 0x39b   :  { %v1175_v5 = vmul.f32 %v2216_v63, %v1174_v4  ;;  %1599 = vperm.xlu2 %2202, %v2487_v23  }
 0x39d   :  { %v1176_v7 = vmul.f32 0.5, %v1175_v5  ;;  %v1161_v12 = vpop.xlane.xlu1 %1160 }
 0x39e   :  { %v1167_v14 = vmul.f32 0.0625, %v1161_v12  ;;  %v2167_v12 = vld [vmem:[%s2983_s9 + $0x68] sm:$0xff] }
 0x39f   :  { %v1177_v17 = vsub.f32 1.5, %v1176_v7  ;;  %v2161_v7 = vld [vmem:[%s2983_s9 + $0x58] sm:$0xff]  ;;  %1725 = vmatpush.msra.mxu1 %v2167_v12 }
 0x3a0   :  { %v2218_v56 = vpop.eup %2217  ;;  %v1171_v49 = vadd.f32 1e-08, %v1167_v14  ;;  %v1266_v55 = vpop.permute.xlu0 %1265  ;;  %v2173_v14 = vld [vmem:[%s2983_s9 + $0x78] sm:$0xff]  ;;  %1645 = vmatpush.msra.mxu0 %v2161_v7 }
 0x3a1   :  { %v1178_v47 = vmul.f32 %v2216_v63, %v1177_v17  ;;  %v1184_v27 = vmul.f32 %v2218_v56, %v1170_v3  ;;  %vm1190_vm12 = vweird.f32 %v2218_v56  ;;  %1805 = vmatpush.msrb.mxu2 %v2173_v14 }
 0x3a2   :  { %2219 = vrsqrt.f32 %v1171_v49  ;;  %vm1191_vm14 = vmor %vm1189_vm13, %vm1190_vm12  ;;  %vm1199_vm0 = vweird.f32 %v1171_v49 }
 0x3a3   :  { %v1182_v26 = vsel %vm1181_vm11, %v2216_v63, %v1178_v47  ;;  %v1185_v51 = vmul.f32 %v2218_v56, %v1184_v27  ;;  %1764 = vperm.xlu2 %2202, %v2577_v15  }
 0x3a4   :  { %v1213_v46 = vmul.f32 %v1182_v26, %v2743_v57  ;;  %v1383_v57 = vpop.permute.xlu2 %1382 }
 0x3a5   :  { %v1186_v23 = vmul.f32 0.5, %v1185_v51  ;;  %v2179_v51 = vld [vmem:[%s2983_s9 + $0x88] sm:$0xff] }
 0x3a6   :  { %1217 = vst.msk [vmem:[#allocation2 + $0x8] sm:$0xff] %vm101_vm4, %v1213_v46 }
 0x3a7   :  { %v1187_v54 = vsub.f32 1.5, %v1186_v23 }
 0x3a8   :  { %v2220_v29 = vpop.eup %2219  ;;  %v2821_v44 = vpop.permute.xlu0 %1280 }
 0x3a9   :  { %v1188_v32 = vmul.f32 %v2218_v56, %v1187_v54  ;;  %v1194_v40 = vmul.f32 %v2220_v29, %v1171_v49  ;;  %vm1200_vm15 = vweird.f32 %v2220_v29  ;;  %v2166_v49 = vld [vmem:[%s2983_s9 + $0x60] sm:$0xff] }
 0x3aa   :  { %vm1201_vm1 = vmor %vm1199_vm0, %vm1200_vm15  ;;  %1726 = vmatpush.msra.mxu1 %v2166_v49 }
 0x3ab   :  { %v1192_v53 = vsel %vm1191_vm14, %v2218_v56, %v1188_v32  ;;  %v1195_v13 = vmul.f32 %v2220_v29, %v1194_v40  ;;  %1684 = vperm.xlu2 %2202, %v2990_v16   ;;  %v2160_v56 = vld [vmem:[%s2983_s9 + $0x50] sm:$0xff] }
 0x3ac   :  { %v1214_v15 = vmul.f32 %v1192_v53, %v2748_v48  ;;  %1646 = vmatpush.msra.mxu0 %v2160_v56 }
 0x3ad   :  { %v1196_v35 = vmul.f32 0.5, %v1195_v13  ;;  %v1372_v45 = vld [vmem:[#allocation2 + $0x5] sm:$0xff] }
 0x3ae   :  { %v1255_v28 = vld [vmem:[#allocation2 + $0x4] sm:$0xff]  ;;  %1218 = vst.msk [vmem:[#allocation2 + $0x10] sm:$0xff] %vm101_vm4, %v1214_v15  ;;  %v1400_v34 = vmul.f32 %v1383_v57, %v1372_v45 }
 0x3af   :  { %v1283_v30 = vmul.f32 %v1266_v55, %v1255_v28  ;;  %v1197_v38 = vsub.f32 1.5, %v1196_v35  ;;  %v1221_v6 = vld [vmem:[#allocation2 + $0x3] sm:$0xff]  ;;  %v2172_v55 = vld [vmem:[%s2983_s9 + $0x70] sm:$0xff] }
 0x3b0   :  { %2144 = vmatmul.msk.f32.vlgmr.msrb.gmra.mxu1 %vm101_vm4, %v1400_v34  ;;  %v1232_v31 = vpop.permute.xlu0 %1231  ;;  %v1452_v42 = vld [vmem:[#allocation2 + $0x7] sm:$0xff]  ;;  %1806 = vmatpush.msrb.mxu2 %v2172_v55 }
 0x3b1   :  { %2134 = vmatmul.msk.f32.vlgmr.msrb.gmra.mxu3 %vm101_vm4, %v1283_v30  ;;  %v1198_v33 = vmul.f32 %v2220_v29, %v1197_v38  ;;  %v1249_v10 = vmul.f32 %v1232_v31, %v1221_v6  ;;  %v2178_v28 = vld [vmem:[%s2983_s9 + $0x80] sm:$0xff] }
 0x3b3   :  { %v1202_v48 = vsel %vm1201_vm1, %v2220_v29, %v1198_v33  ;;  %1849 = vperm.xlu2 %2202, %v2991_v39   ;;  %2138 = vmatmul.msk.f32.vlgmr.msrb.gmra.mxu0 %vm101_vm4, %v1249_v10 }
 0x3b4   :  { %v1215_v9 = vmul.f32 %v1202_v48, %v2753_v36 }
 0x3b5   :  { %v1463_v50 = vpop.permute.xlu1 %1462  ;;  %v2831_v41 = vld [vmem:[#allocation2 + $0xc] sm:$0xff] }
 0x3b6   :  { %1219 = vst.msk [vmem:[#allocation2 + $0x18] sm:$0xff] %vm101_vm4, %v1215_v9  ;;  %v1480_v43 = vmul.f32 %v1463_v50, %v1452_v42  ;;  %v1284_v8 = vmul.f32 %v2809_v59, %v2831_v41  ;;  %v2838_v60 = vld [vmem:[#allocation2 + $0xb] sm:$0xff] }
 0x3b7   :  { %v1453_v19 = vld [vmem:[#allocation2 + $0xf] sm:$0xff] }
 0x3b8   :  { %2150 = vmatmul.msk.f32.vlgmr.msra.gmra.mxu2 %vm101_vm4, %v1480_v43  ;;  %v1237_v61 = vpop.permute.xlu0 %1236  ;;  %v2859_v4 = vld [vmem:[#allocation2 + $0xd] sm:$0xff] }
 0x3b9   :  { %2135 = vmatmul.msk.f32.gmra.mxu3 %vm101_vm4, %v1284_v8  ;;  %v1250_v18 = vmul.f32 %v1237_v61, %v2838_v60  ;;  %v1584_v42 = vld [vmem:[#allocation2 + $0x9] sm:$0xff] }
 0x3bb   :  { %2139 = vmatmul.msk.f32.gmra.mxu0 %vm101_vm4, %v1250_v18  ;;  %v1532_v18 = vld [vmem:[#allocation2 + $0x8] sm:$0xff] }
 0x3bd   :  { %v1468_v36 = vpop.permute.xlu1 %1467  ;;  %v2842_v20 = vld [vmem:[#allocation2 + $0x14] sm:$0xff] }
 0x3be   :  { %v1481_v22 = vmul.f32 %v1468_v36, %v1453_v19  ;;  %v1285_v24 = vmul.f32 %v2788_v11, %v2842_v20  ;;  %v2848_v21 = vld [vmem:[#allocation2 + $0x13] sm:$0xff]  ;;  %v2155_v11 = vld [vmem:[%s2983_s9 + $0x48] sm:$0xff] }
 0x3bf   :  { %v1454_v59 = vld [vmem:[#allocation2 + $0x17] sm:$0xff]  ;;  %1565 = vmatpush.msra.mxu3 %v2155_v11 }
 0x3c0   :  { %2151 = vmatmul.msk.f32.gmra.mxu2 %vm101_vm4, %v1481_v22  ;;  %v1242_v25 = vpop.permute.xlu0 %1241  ;;  %v2884_v29 = vld [vmem:[#allocation2 + $0x15] sm:$0xff] }
 0x3c1   :  { %2136 = vmatmul.msk.f32.gmra.mxu3 %vm101_vm4, %v1285_v24  ;;  %v1251_v37 = vmul.f32 %v1242_v25, %v2848_v21  ;;  %v1585_v24 = vld [vmem:[#allocation2 + $0x11] sm:$0xff] }
 0x3c2   :  { %1566 = vmatpush.msra.mxu3 %v2154_v2 }
 0x3c3   :  { %2140 = vmatmul.msk.f32.gmra.mxu0 %vm101_vm4, %v1251_v37  ;;  %v1533_v37 = vld [vmem:[#allocation2 + $0x10] sm:$0xff] }
 0x3c4   :  { %1885 = vmatpush.msrb.mxu3 %v2179_v51 }
 0x3c5   :  { %v1473_v58 = vpop.permute.xlu1 %1472 }
 0x3c6   :  { %v1482_v62 = vmul.f32 %v1473_v58, %v1454_v59  ;;  %1886 = vmatpush.msrb.mxu3 %v2178_v28 }
 0x3c8   :  { %2152 = vmatmul.msk.f32.gmra.mxu2 %vm101_vm4, %v1482_v62  ;;  %v1247_v23 = vpop.permute.xlu0 %1246 }
 0x3cd   :  { %v1478_v63 = vpop.permute.xlu1 %1477 }
 0x3d0   :  { %v1595_v45 = vpop.permute.xlu0 %1594 }
 0x3d1   :  { %v1612_v8 = vmul.f32 %v1595_v45, %v1584_v42 }
 0x3d5   :  { %v1755_v27 = vpop.permute.xlu1 %1754 }
 0x3d6   :  { %v1164_v0 = vpop.xlane.xlu2 %1163 }
 0x3d7   :  { %v1168_v1 = vmul.f32 0.0625, %v1164_v0 }
 0x3d8   :  { %v1760_v39 = vpop.permute.xlu0 %1759 }
 0x3d9   :  { %v1172_v3 = vadd.f32 1e-08, %v1168_v1  ;;  %v1534_v1 = vld [vmem:[#allocation2 + $0x18] sm:$0xff] }
 0x3db   :  { %2221 = vrsqrt.f32 %v1172_v3  ;;  %vm1209_vm3 = vweird.f32 %v1172_v3 }
 0x3dd   :  { %v1675_v15 = vpop.permute.xlu1 %1674 }
 0x3de   :  { %v1388_v5 = vpop.permute.xlu2 %1387  ;;  %v1692_v43 = vmul.f32 %v1675_v15, %v2838_v60  ;;  %v1773_v60 = vmul.f32 %v1760_v39, %v2842_v20 }
 0x3df   :  { %v1401_v17 = vmul.f32 %v1388_v5, %v2859_v4 }
 0x3e0   :  { %v1680_v36 = vpop.permute.xlu0 %1679 }
 0x3e1   :  { %v2222_v47 = vpop.eup %2221  ;;  %2145 = vmatmul.msk.f32.gmra.mxu1 %vm101_vm4, %v1401_v17  ;;  %v1693_v22 = vmul.f32 %v1680_v36, %v2848_v21 }
 0x3e2   :  { %v1204_v26 = vmul.f32 %v2222_v47, %v1172_v3  ;;  %vm1210_vm2 = vweird.f32 %v2222_v47 }
 0x3e3   :  { %vm1211_vm5 = vmor %vm1209_vm3, %vm1210_vm2 }
 0x3e4   :  { %v1205_v46 = vmul.f32 %v2222_v47, %v1204_v26 }
 0x3e5   :  { %v2893_v34 = vpop.permute.xlu1 %1839 }
 0x3e6   :  { %v1206_v54 = vmul.f32 0.5, %v1205_v46  ;;  %v1393_v32 = vpop.permute.xlu2 %1392  ;;  %v1853_v49 = vmul.f32 %v2893_v34, %v2884_v29 }
 0x3e7   :  { %v1402_v40 = vmul.f32 %v2884_v29, %v1393_v32 }
 0x3e8   :  { %v1207_v53 = vsub.f32 1.5, %v1206_v54  ;;  %v1845_v58 = vpop.permute.xlu0 %1844 }
 0x3e9   :  { %2146 = vmatmul.msk.f32.gmra.mxu1 %vm101_vm4, %v1402_v40 }
 0x3ea   :  { %v1208_v13 = vmul.f32 %v2222_v47, %v1207_v53 }
 0x3ec   :  { %v1212_v16 = vsel %vm1211_vm5, %v2222_v47, %v1208_v13 }
 0x3ed   :  { %v1216_v35 = vmul.f32 %v1212_v16, %v2769_v52  ;;  %v1605_v61 = vpop.permute.xlu1 %1604 }
 0x3ee   :  { %v1398_v57 = vpop.permute.xlu2 %1397 }
 0x3ef   :  { %1220 = vst.msk [vmem:[#allocation2 + $0x20] sm:$0xff] %vm101_vm4, %v1216_v35 }
 0x3f0   :  { %v1610_v5 = vpop.permute.xlu0 %1609 }
 0x3f6   :  { %v2895_v30 = vld [vmem:[#allocation2 + $0x1d] sm:$0xff]  ;;  %v1835_v38 = vpop.permute.xlu2 %1834 }
 0x3f7   :  { %v1403_v6 = vmul.f32 %v2895_v30, %v1398_v57  ;;  %v1258_v31 = vld [vmem:[#allocation2 + $0x1c] sm:$0xff]  ;;  %v1852_v56 = vmul.f32 %v1835_v38, %v2859_v4  ;;  %v1854_v55 = vmul.f32 %v1845_v58, %v2895_v30 }
 0x3f8   :  { %v1224_v33 = vld [vmem:[#allocation2 + $0x1b] sm:$0xff]  ;;  %v1286_v52 = vmul.f32 %v2821_v44, %v1258_v31  ;;  %v1772_v44 = vmul.f32 %v1755_v27, %v2831_v41  ;;  %v1770_v41 = vpop.permute.xlu1 %1769  ;;  %v1667_v3 = vld [vmem:[#allocation2 + $0x23] sm:$0xff] }
 0x3f9   :  { %v1252_v10 = vmul.f32 %v1247_v23, %v1224_v33  ;;  %v1455_v48 = vld [vmem:[#allocation2 + $0x1f] sm:$0xff]  ;;  %2147 = vmatmul.msk.f32.gmra.mxu1 %vm101_vm4, %v1403_v6 }
 0x3fa   :  { %v1483_v9 = vmul.f32 %v1478_v63, %v1455_v48  ;;  %2137 = vmatmul.msk.f32.gmra.mxu3 %vm101_vm4, %v1286_v52  ;;  %v1586_v59 = vld [vmem:[#allocation2 + $0x19] sm:$0xff]  ;;  %v1587_v2 = vld [vmem:[#allocation2 + $0x21] sm:$0xff] }
 0x3fb   :  { %2141 = vmatmul.msk.f32.gmra.mxu0 %vm101_vm4, %v1252_v10  ;;  %v1614_v0 = vmul.f32 %v1605_v61, %v1586_v59  ;;  %v1747_v63 = vld [vmem:[#allocation2 + $0x24] sm:$0xff]  ;;  %v1615_v12 = vmul.f32 %v1610_v5, %v1587_v2 }
 0x3fc   :  { %2153 = vmatmul.msk.f32.gmra.mxu2 %vm101_vm4, %v1483_v9  ;;  %v1775_v14 = vmul.f32 %v1770_v41, %v1747_v63  ;;  %v1535_v17 = vld [vmem:[#allocation2 + $0x20] sm:$0xff] }
 0x3fd   :  { %v1827_v27 = vld [vmem:[#allocation2 + $0x25] sm:$0xff] }
 0x3fe   :  { %v1600_v50 = vpop.permute.xlu2 %1599 }
 0x3ff   :  { %v1613_v25 = vmul.f32 %v1600_v50, %v1585_v24 }
 0x400   :  { %v1690_v20 = vpop.permute.xlu1 %1689 }
 0x401   :  { %2168 = vmatmul.msk.f32.vlgmr.msra.gmra.mxu1 %vm101_vm4, %v1692_v43  ;;  %v1695_v7 = vmul.f32 %v1690_v20, %v1667_v3 }
 0x402   :  { %2156 = vmatmul.msk.f32.vlgmr.msra.gmra.mxu3 %vm101_vm4, %v1532_v18 }
 0x403   :  { %2162 = vmatmul.msk.f32.vlgmr.msra.gmra.mxu0 %vm101_vm4, %v1612_v8 }
 0x404   :  { %2174 = vmatmul.msk.f32.vlgmr.msrb.gmra.mxu2 %vm101_vm4, %v1772_v44 }
 0x406   :  { %v1765_v19 = vpop.permute.xlu2 %1764 }
 0x407   :  { %v1774_v21 = vmul.f32 %v1765_v19, %v1258_v31 }
 0x409   :  { %2169 = vmatmul.msk.f32.gmra.mxu1 %vm101_vm4, %v1693_v22 }
 0x40a   :  { %2157 = vmatmul.msk.f32.gmra.mxu3 %vm101_vm4, %v1533_v37 }
 0x40b   :  { %2163 = vmatmul.msk.f32.gmra.mxu0 %vm101_vm4, %v1613_v25 }
 0x40c   :  { %2175 = vmatmul.msk.f32.gmra.mxu2 %vm101_vm4, %v1773_v60  ;;  %v2206_v60 = vld [vmem:[%s2984_s10] ss:$0 sm:$0xff] }
 0x40e   :  { %v1685_v62 = vpop.permute.xlu2 %1684 }
 0x40f   :  { %v1694_v11 = vmul.f32 %v1685_v62, %v1224_v33 }
 0x411   :  { %2170 = vmatmul.msk.f32.gmra.mxu1 %vm101_vm4, %v1694_v11 }
 0x412   :  { %2158 = vmatmul.msk.f32.gmra.mxu3 %vm101_vm4, %v1534_v1 }
 0x413   :  { %2164 = vmatmul.msk.f32.gmra.mxu0 %vm101_vm4, %v1614_v0 }
 0x414   :  { %2176 = vmatmul.msk.f32.gmra.mxu2 %vm101_vm4, %v1774_v21 }
 0x416   :  { %v1850_v47 = vpop.permute.xlu2 %1849 }
 0x417   :  { %v1855_v26 = vmul.f32 %v1850_v47, %v1827_v27 }
 0x419   :  { %2171 = vmatmul.msk.f32.gmra.mxu1 %vm101_vm4, %v1695_v7 }
 0x41a   :  { %2159 = vmatmul.msk.f32.gmra.mxu3 %vm101_vm4, %v1535_v17 }
 0x41b   :  { %2165 = vmatmul.msk.f32.gmra.mxu0 %vm101_vm4, %v1615_v12 }
 0x41c   :  { %2177 = vmatmul.msk.f32.gmra.mxu2 %vm101_vm4, %v1775_v14 }
 0x422   :  { %2180 = vmatmul.msk.f32.vlgmr.msrb.gmra.mxu3 %vm101_vm4, %v1852_v56 }
 0x42a   :  { %2181 = vmatmul.msk.f32.gmra.mxu3 %vm101_vm4, %v1853_v49 }
 0x42d   :  { %v1436_v4 = vpop.f32.mrf.mxu1 }
 0x430   :  { %v1360_v23 = vpop.f32.mrf.mxu0 }
 0x432   :  { %2182 = vmatmul.msk.f32.gmra.mxu3 %vm101_vm4, %v1854_v55 }
 0x434   :  { %v1319_v51 = vpop.f32.mrf.mxu3 }
 0x435   :  { %v1361_v30 = vadd.f32 %v1360_v23, %v1319_v51 }
 0x437   :  { %v1448_v6 = vadd.f32 %v1436_v4, %v1361_v30 }
 0x438   :  { %v1363_v40 = vpop.f32.mrf.mxu0 }
 0x43a   :  { %2183 = vmatmul.msk.f32.gmra.mxu3 %vm101_vm4, %v1855_v26 }
 0x43b   :  { %v1516_v32 = vpop.f32.mrf.mxu2 }
 0x43c   :  { %v1322_v46 = vpop.f32.mrf.mxu3  ;;  %v1528_v52 = vadd.f32 %v1516_v32, %v1448_v6 }
 0x43d   :  { %v1364_v10 = vadd.f32 %v1363_v40, %v1322_v46 }
 0x440   :  { %v1366_v16 = vpop.f32.mrf.mxu0 }
 0x443   :  { %v1519_v13 = vpop.f32.mrf.mxu2 }
 0x444   :  { %v1325_v54 = vpop.f32.mrf.mxu3 }
 0x445   :  { %v1367_v44 = vadd.f32 %v1366_v16, %v1325_v54 }
 0x44b   :  { %v1522_v57 = vpop.f32.mrf.mxu2 }
 0x45e   :  { %v1439_v53 = vpop.f32.mrf.mxu1 }
 0x45f   :  { %v1449_v9 = vadd.f32 %v1439_v53, %v1364_v10 }
 0x461   :  { %v1529_v8 = vadd.f32 %v1519_v13, %v1449_v9 }
 0x466   :  { %v1442_v35 = vpop.f32.mrf.mxu1 }
 0x467   :  { %v1450_v19 = vadd.f32 %v1442_v35, %v1367_v44 }
 0x469   :  { %v1530_v58 = vadd.f32 %v1522_v57, %v1450_v19 }
 0x476   :  { %v1445_v34 = vpop.f32.mrf.mxu1 }
 0x478   :  { %v1369_v45 = vpop.f32.mrf.mxu0 }
 0x47d   :  { %v1328_v29 = vpop.f32.mrf.mxu3 }
 0x47e   :  { %v1728_v39 = vpop.f32.mrf.mxu1  ;;  %v1370_v41 = vadd.f32 %v1369_v45, %v1328_v29 }
 0x47f   :  { %v1525_v38 = vpop.f32.mrf.mxu2 }
 0x480   :  { %v1648_v31 = vpop.f32.mrf.mxu0  ;;  %v1451_v20 = vadd.f32 %v1445_v34, %v1370_v41 }
 0x482   :  { %v1531_v12 = vadd.f32 %v1525_v38, %v1451_v20 }
 0x485   :  { %v1568_v15 = vpop.f32.mrf.mxu3 }
 0x486   :  { %v1580_v48 = vadd.f32 %v1568_v15, %v1528_v52  ;;  %v1731_v22 = vpop.f32.mrf.mxu1 }
 0x487   :  { %v1808_v42 = vpop.f32.mrf.mxu2 }
 0x488   :  { %v1660_v50 = vadd.f32 %v1648_v31, %v1580_v48  ;;  %v1651_v61 = vpop.f32.mrf.mxu0 }
 0x48a   :  { %v1740_v18 = vadd.f32 %v1728_v39, %v1660_v50 }
 0x48c   :  { %v1820_v24 = vadd.f32 %v1808_v42, %v1740_v18 }
 0x48d   :  { %v1571_v28 = vpop.f32.mrf.mxu3 }
 0x48e   :  { %v1581_v36 = vadd.f32 %v1571_v28, %v1529_v8  ;;  %v1734_v5 = vpop.f32.mrf.mxu1 }
 0x48f   :  { %v1811_v62 = vpop.f32.mrf.mxu2 }
 0x490   :  { %v1661_v25 = vadd.f32 %v1651_v61, %v1581_v36  ;;  %v1654_v1 = vpop.f32.mrf.mxu0 }
 0x492   :  { %v1741_v11 = vadd.f32 %v1731_v22, %v1661_v25 }
 0x494   :  { %v1821_v63 = vadd.f32 %v1811_v62, %v1741_v11 }
 0x495   :  { %v1574_v33 = vpop.f32.mrf.mxu3 }
 0x496   :  { %v1582_v0 = vadd.f32 %v1574_v33, %v1530_v58  ;;  %v1737_v32 = vpop.f32.mrf.mxu1 }
 0x497   :  { %v1814_v55 = vpop.f32.mrf.mxu2 }
 0x498   :  { %v1662_v3 = vadd.f32 %v1654_v1, %v1582_v0  ;;  %v1657_v26 = vpop.f32.mrf.mxu0 }
 0x49a   :  { %v1742_v17 = vadd.f32 %v1734_v5, %v1662_v3 }
 0x49c   :  { %v1822_v46 = vadd.f32 %v1814_v55, %v1742_v17 }
 0x49d   :  { %v1577_v43 = vpop.f32.mrf.mxu3 }
 0x49e   :  { %v1583_v56 = vadd.f32 %v1577_v43, %v1531_v12 }
 0x49f   :  { %v1817_v15 = vpop.f32.mrf.mxu2 }
 0x4a0   :  { %v1663_v23 = vadd.f32 %v1657_v26, %v1583_v56 }
 0x4a2   :  { %v1743_v40 = vadd.f32 %v1737_v32, %v1663_v23 }
 0x4a4   :  { %v1823_v57 = vadd.f32 %v1817_v15, %v1743_v40 }
 0x4a5   :  { %v1888_v37 = vpop.f32.mrf.mxu3 }
 0x4a6   :  { %v1900_v59 = vadd.f32 %v1888_v37, %v1820_v24 }
 0x4a8   :  { %v1908_v21 = vadd.f32 %v2206_v60, %v1900_v59 }
 0x4aa   :  { %v2184_v2 = vmul.f32 -1.442695, %v1908_v21 }
 0x4ac   :  { %2223 = vpow2.f32 %v2184_v2 }
 0x4ad   :  { %v1891_v7 = vpop.f32.mrf.mxu3 }
 0x4ae   :  { %v1901_v14 = vadd.f32 %v1891_v7, %v1821_v63 }
 0x4b0   :  { %v1909_v49 = vadd.f32 %v2206_v60, %v1901_v14 }
 0x4b2   :  { %v2224_v47 = vpop.eup %2223  ;;  %v2185_v27 = vmul.f32 -1.442695, %v1909_v49 }
 0x4b3   :  { %v1924_v51 = vadd.f32 1.0, %v2224_v47 }
 0x4b4   :  { %2225 = vpow2.f32 %v2185_v27 }
 0x4b5   :  { %2227 = vrcp.f32 %v1924_v51  ;;  %v1894_v4 = vpop.f32.mrf.mxu3  ;;  %v1939_v38 = vand.u32 2147483648, %v1924_v51  ;;  %v1937_v33 = vand.u32 2147483647, %v1924_v51  ;;  %vm1933_vm6 = vweird.f32 %v1924_v51 }
 0x4b6   :  { %v1902_v54 = vadd.f32 %v1894_v4, %v1822_v46 }
 0x4b7   :  { %v1940_v50 = vor.u32 1.1754944e-38, %v1939_v38  ;;  %vm1938_vm8 = vcmp.eq.f32.partialorder %v1937_v33, 8.507059e+37 }
 0x4b8   :  { %v1910_v53 = vadd.f32 %v2206_v60, %v1902_v54 }
 0x4ba   :  { %v2226_v29 = vpop.eup %2225  ;;  %v2186_v13 = vmul.f32 -1.442695, %v1910_v53 }
 0x4bb   :  { %v2228_v16 = vpop.eup %2227  ;;  %v1925_v35 = vadd.f32 1.0, %v2226_v29 }
 0x4bc   :  { %2229 = vpow2.f32 %v2186_v13  ;;  %v1929_v45 = vmul.f32 %v2228_v16, %v1924_v51  ;;  %vm1934_vm4 = vweird.f32 %v2228_v16 }
 0x4bd   :  { %2231 = vrcp.f32 %v1925_v35  ;;  %v1897_v28 = vpop.f32.mrf.mxu3  ;;  %vm1935_vm7 = vmor %vm1933_vm6, %vm1934_vm4  ;;  %v1954_v18 = vand.u32 2147483648, %v1925_v35  ;;  %v1952_v22 = vand.u32 2147483647, %v1925_v35  ;;  %vm1948_vm11 = vweird.f32 %v1925_v35 }
 0x4be   :  { %v1903_v34 = vadd.f32 %v1897_v28, %v1823_v57  ;;  %v1930_v30 = vsub.f32 1.0, %v1929_v45 }
 0x4bf   :  { %v1955_v41 = vor.u32 1.1754944e-38, %v1954_v18  ;;  %vm1953_vm13 = vcmp.eq.f32.partialorder %v1952_v22, 8.507059e+37 }
 0x4c0   :  { %v1911_v6 = vadd.f32 %v2206_v60, %v1903_v34  ;;  %v1931_v31 = vmul.f32 %v2228_v16, %v1930_v30 }
 0x4c2   :  { %v2230_v52 = vpop.eup %2229  ;;  %v2187_v10 = vmul.f32 -1.442695, %v1911_v6  ;;  %v1932_v48 = vadd.f32 %v2228_v16, %v1931_v31 }
 0x4c3   :  { %v2232_v39 = vpop.eup %2231  ;;  %v1926_v9 = vadd.f32 1.0, %v2230_v52 }
 0x4c4   :  { %2233 = vpow2.f32 %v2187_v10  ;;  %v1936_v42 = vsel %vm1935_vm7, %v2228_v16, %v1932_v48  ;;  %v1944_v43 = vmul.f32 %v2232_v39, %v1925_v35  ;;  %vm1949_vm10 = vweird.f32 %v2232_v39 }
 0x4c5   :  { %2235 = vrcp.f32 %v1926_v9  ;;  %v2934_v8 = vsel %vm1938_vm8, %v1940_v50, %v1936_v42  ;;  %vm1950_vm12 = vmor %vm1948_vm11, %vm1949_vm10  ;;  %v1969_v21 = vand.u32 2147483648, %v1926_v9  ;;  %v1967_v2 = vand.u32 2147483647, %v1926_v9 }
 0x4c6   :  { %v1988_v61 = vmul.f32 %v2934_v8, %v2934_v8  ;;  %v1945_v44 = vsub.f32 1.0, %v1944_v43  ;;  %vm1963_vm15 = vweird.f32 %v1926_v9 }
 0x4c7   :  { %v1970_v5 = vor.u32 1.1754944e-38, %v1969_v21  ;;  %vm1968_vm1 = vcmp.eq.f32.partialorder %v1967_v2, 8.507059e+37 }
 0x4c8   :  { %v1993_v36 = vsel %vm1992_vm9, %v1988_v61, 0.0  ;;  %v1946_v19 = vmul.f32 %v2232_v39, %v1945_v44 }
 0x4c9   :  { %1994 = vadd.xlane.f32.xlu0 %v1993_v36 }
 0x4ca   :  { %v2234_v24 = vpop.eup %2233  ;;  %v1947_v25 = vadd.f32 %v2232_v39, %v1946_v19 }
 0x4cb   :  { %v2236_v60 = vpop.eup %2235  ;;  %v1927_v37 = vadd.f32 1.0, %v2234_v24 }
 0x4cc   :  { %v1951_v58 = vsel %vm1950_vm12, %v2232_v39, %v1947_v25  ;;  %v1959_v59 = vmul.f32 %v2236_v60, %v1926_v9  ;;  %vm1964_vm14 = vweird.f32 %v2236_v60 }
 0x4cd   :  { %2237 = vrcp.f32 %v1927_v37  ;;  %v2939_v62 = vsel %vm1953_vm13, %v1955_v41, %v1951_v58  ;;  %vm1965_vm0 = vmor %vm1963_vm15, %vm1964_vm14  ;;  %v1984_v49 = vand.u32 2147483648, %v1927_v37  ;;  %v1982_v27 = vand.u32 2147483647, %v1927_v37 }
 0x4ce   :  { %v1989_v11 = vmul.f32 %v2939_v62, %v2939_v62  ;;  %v1960_v0 = vsub.f32 1.0, %v1959_v59  ;;  %vm1978_vm3 = vweird.f32 %v1927_v37 }
 0x4cf   :  { %v1985_v51 = vor.u32 1.1754944e-38, %v1984_v49  ;;  %vm1983_vm4 = vcmp.eq.f32.partialorder %v1982_v27, 8.507059e+37 }
 0x4d0   :  { %v1996_v1 = vsel %vm1992_vm9, %v1989_v11, 0.0  ;;  %v1961_v20 = vmul.f32 %v2236_v60, %v1960_v0 }
 0x4d1   :  { %1997 = vadd.xlane.f32.xlu2 %v1996_v1 }
 0x4d2   :  { %v1962_v63 = vadd.f32 %v2236_v60, %v1961_v20 }
 0x4d3   :  { %v2238_v3 = vpop.eup %2237 }
 0x4d4   :  { %v1966_v7 = vsel %vm1965_vm0, %v2236_v60, %v1962_v63  ;;  %v1974_v12 = vmul.f32 %v2238_v3, %v1927_v37  ;;  %vm1979_vm2 = vweird.f32 %v2238_v3 }
 0x4d5   :  { %v2944_v14 = vsel %vm1968_vm1, %v1970_v5, %v1966_v7  ;;  %vm1980_vm5 = vmor %vm1978_vm3, %vm1979_vm2 }
 0x4d6   :  { %v1990_v17 = vmul.f32 %v2944_v14, %v2944_v14  ;;  %v1975_v56 = vsub.f32 1.0, %v1974_v12 }
 0x4d8   :  { %v1999_v55 = vsel %vm1992_vm9, %v1990_v17, 0.0  ;;  %v1976_v47 = vmul.f32 %v2238_v3, %v1975_v56 }
 0x4d9   :  { %2000 = vadd.xlane.f32.xlu1 %v1999_v55 }
 0x4da   :  { %v1977_v26 = vadd.f32 %v2238_v3, %v1976_v47 }
 0x4dc   :  { %v1981_v46 = vsel %vm1980_vm5, %v2238_v3, %v1977_v26 }
 0x4dd   :  { %v2949_v23 = vsel %vm1983_vm4, %v1985_v51, %v1981_v46 }
 0x4de   :  { %v1991_v4 = vmul.f32 %v2949_v23, %v2949_v23 }
 0x4e0   :  { %v2002_v54 = vsel %vm1992_vm9, %v1991_v4, 0.0 }
 0x4e1   :  { %2003 = vadd.xlane.f32.xlu0 %v2002_v54 }
 0x53c   :  { %v1995_v32 = vpop.xlane.xlu0 %1994 }
 0x53d   :  { %v2005_v40 = vmul.f32 0.33333334, %v1995_v32 }
 0x53f   :  { %v2009_v53 = vadd.f32 1e-08, %v2005_v40 }
 0x541   :  { %2239 = vrsqrt.f32 %v2009_v53  ;;  %vm2019_vm7 = vweird.f32 %v2009_v53 }
 0x544   :  { %v1998_v29 = vpop.xlane.xlu2 %1997 }
 0x545   :  { %v2006_v13 = vmul.f32 0.33333334, %v1998_v29 }
 0x547   :  { %v2240_v16 = vpop.eup %2239  ;;  %v2010_v15 = vadd.f32 1e-08, %v2006_v13 }
 0x548   :  { %v2014_v35 = vmul.f32 %v2240_v16, %v2009_v53  ;;  %vm2020_vm6 = vweird.f32 %v2240_v16 }
 0x549   :  { %2241 = vrsqrt.f32 %v2010_v15  ;;  %vm2021_vm8 = vmor %vm2019_vm7, %vm2020_vm6  ;;  %vm2029_vm11 = vweird.f32 %v2010_v15 }
 0x54a   :  { %v2015_v57 = vmul.f32 %v2240_v16, %v2014_v35 }
 0x54c   :  { %v2016_v45 = vmul.f32 0.5, %v2015_v57  ;;  %v2001_v28 = vpop.xlane.xlu1 %2000 }
 0x54d   :  { %v2007_v34 = vmul.f32 0.33333334, %v2001_v28 }
 0x54e   :  { %v2017_v30 = vsub.f32 1.5, %v2016_v45 }
 0x54f   :  { %v2242_v38 = vpop.eup %2241  ;;  %v2011_v6 = vadd.f32 1e-08, %v2007_v34 }
 0x550   :  { %v2018_v31 = vmul.f32 %v2240_v16, %v2017_v30  ;;  %v2024_v33 = vmul.f32 %v2242_v38, %v2010_v15  ;;  %vm2030_vm10 = vweird.f32 %v2242_v38 }
 0x551   :  { %2243 = vrsqrt.f32 %v2011_v6  ;;  %vm2031_vm12 = vmor %vm2029_vm11, %vm2030_vm10  ;;  %vm2039_vm14 = vweird.f32 %v2011_v6 }
 0x552   :  { %v2022_v52 = vsel %vm2021_vm8, %v2240_v16, %v2018_v31  ;;  %v2025_v10 = vmul.f32 %v2242_v38, %v2024_v33 }
 0x553   :  { %v2053_v48 = vmul.f32 %v2022_v52, %v2934_v8 }
 0x554   :  { %v2026_v39 = vmul.f32 0.5, %v2025_v10  ;;  %v2004_v9 = vpop.xlane.xlu0 %2003 }
 0x555   :  { %2057 = vst.msk [vmem:[%s2985_s11] sm:$0xff] %vm1992_vm9, %v2053_v48  ;;  %v2008_v50 = vmul.f32 0.33333334, %v2004_v9 }
 0x556   :  { %v2027_v42 = vsub.f32 1.5, %v2026_v39 }
 0x557   :  { %v2244_v43 = vpop.eup %2243  ;;  %v2012_v61 = vadd.f32 1e-08, %v2008_v50 }
 0x558   :  { %v2028_v44 = vmul.f32 %v2242_v38, %v2027_v42  ;;  %v2034_v18 = vmul.f32 %v2244_v43, %v2011_v6  ;;  %vm2040_vm13 = vweird.f32 %v2244_v43 }
 0x559   :  { %2245 = vrsqrt.f32 %v2012_v61  ;;  %vm2041_vm15 = vmor %vm2039_vm14, %vm2040_vm13  ;;  %vm2049_vm1 = vweird.f32 %v2012_v61 }
 0x55a   :  { %v2032_v36 = vsel %vm2031_vm12, %v2242_v38, %v2028_v44  ;;  %v2035_v19 = vmul.f32 %v2244_v43, %v2034_v18 }
 0x55b   :  { %v2054_v8 = vmul.f32 %v2032_v36, %v2939_v62 }
 0x55c   :  { %v2036_v22 = vmul.f32 0.5, %v2035_v19 }
 0x55d   :  { %2058 = vst.msk [vmem:[%s2985_s11 + $0x8] sm:$0xff] %vm1992_vm9, %v2054_v8 }
 0x55e   :  { %v2037_v24 = vsub.f32 1.5, %v2036_v22 }
 0x55f   :  { %v2246_v25 = vpop.eup %2245 }
 0x560   :  { %v2038_v60 = vmul.f32 %v2244_v43, %v2037_v24  ;;  %v2044_v37 = vmul.f32 %v2246_v25, %v2012_v61  ;;  %vm2050_vm0 = vweird.f32 %v2246_v25 }
 0x561   :  { %vm2051_vm2 = vmor %vm2049_vm1, %vm2050_vm0 }
 0x562   :  { %v2042_v41 = vsel %vm2041_vm15, %v2244_v43, %v2038_v60  ;;  %v2045_v58 = vmul.f32 %v2246_v25, %v2044_v37 }
 0x563   :  { %v2055_v59 = vmul.f32 %v2042_v41, %v2944_v14 }
 0x564   :  { %v2046_v11 = vmul.f32 0.5, %v2045_v58 }
 0x565   :  { %2059 = vst.msk [vmem:[%s2985_s11 + $0x10] sm:$0xff] %vm1992_vm9, %v2055_v59 }
 0x566   :  { %v2047_v62 = vsub.f32 1.5, %v2046_v11 }
 0x568   :  { %v2048_v0 = vmul.f32 %v2246_v25, %v2047_v62 }
 0x56a   :  { %v2052_v21 = vsel %vm2051_vm2, %v2246_v25, %v2048_v0 }
 0x56b   :  { %v2056_v1 = vmul.f32 %v2052_v21, %v2949_v23 }
 0x56d   :  { %2060 = vst.msk [vmem:[%s2985_s11 + $0x18] sm:$0xff] %vm1992_vm9, %v2056_v1 }
 0x56e   :  { %2065 = vsyncpa [#allocation4], 1 }
 0x56f   :  { %2066 = vsyncpa [#allocation6], 1 }
 0x570   :  { %2067 = vsyncpa [#allocation9], 1 }

</bundles_post_ra>
